<compile_context>
chip_gen: v6e
topology: v6e:2x2x1
jax: 0.10.0
libtpu: 0.0.40
codegen_flags: <defaults>
</compile_context>

<pallas_src>
import jax
import jax.numpy as jnp
from jax.experimental import pallas as pl
from jax.experimental.pallas import tpu as pltpu


# ----------------------------- Pallas kernel --------------------------------

def fused_gnn_lstm_kernel(h_ref, ht_ref, dinv_ref, binv_ref, xp_ref, b1_ref,
                          th2_ref, b2_ref, wih_ref, whh_ref, bl_ref,
                          wout_ref, bout_ref, out_ref):
    T = h_ref.shape[0]          # static
    Hd = whh_ref.shape[0]       # true hidden width (16); gates are i|f|g|o
    Np = out_ref.shape[0]

    # Hoist all time-invariant operands out of the unrolled time loop.
    xp = xp_ref[...]            # [Np, Dp] bf16  (usr_emb @ Theta1, precomputed)
    th2 = th2_ref[...]          # [Dp, Dp] bf16
    wih = wih_ref[...]          # [Dp, GL] bf16
    whh = whh_ref[...]          # [Hd, GL] bf16
    b1 = b1_ref[...]            # [1, Dp]  f32
    b2 = b2_ref[...]            # [1, Dp]  f32
    bl = bl_ref[...]            # [1, GL]  f32

    h = jnp.zeros((Np, Hd), jnp.float32)
    c = jnp.zeros((Np, Hd), jnp.float32)

    def propagate(inc, inct, dinv, binv, x_bf16):
        # A_t @ X = Dinv ⊙ (H (Binv ⊙ (H^T X)))  -- two thin MXU matmuls,
        # f32 accumulation, f32 degree scalings (lane-broadcast on the VPU).
        s = jnp.dot(inct, x_bf16, preferred_element_type=jnp.float32)   # [Ep, Dp]
        s = s * binv
        z = jnp.dot(inc, s.astype(jnp.bfloat16),
                    preferred_element_type=jnp.float32)                 # [Np, Dp]
        return z * dinv

    # Statically unrolled time loop (T is tiny); lets the scheduler overlap the
    # h-independent conv matmuls of step t+1 with step t's LSTM EUP work.
    for t in range(T):
        inc = h_ref[t]          # [Np, Ep] bf16
        inct = ht_ref[t]        # [Ep, Np] bf16
        dinv = dinv_ref[t]      # [Np, 1]  f32
        binv = binv_ref[t]      # [Ep, 1]  f32

        # Layer 1: relu(A_t @ (X @ Theta1) + b1); X @ Theta1 hoisted to wrapper.
        x1 = jnp.maximum(propagate(inc, inct, dinv, binv, xp) + b1, 0.0)

        # Layer 2: relu(A_t @ (x1 @ Theta2) + b2)
        y = jnp.dot(x1.astype(jnp.bfloat16), th2,
                    preferred_element_type=jnp.float32)
        x2 = jnp.maximum(
            propagate(inc, inct, dinv, binv, y.astype(jnp.bfloat16)) + b2, 0.0)

        # Fused LSTM step. Gates are packed i|f|g|o in one 128-lane slab
        # (4*Hd = 64 valid lanes), so the gate matmul output is a single vreg
        # wide instead of 4 per-gate 128-lane slabs.
        gates = (jnp.dot(x2.astype(jnp.bfloat16), wih,
                         preferred_element_type=jnp.float32)
                 + jnp.dot(h.astype(jnp.bfloat16), whh,
                           preferred_element_type=jnp.float32)
                 + bl)                                           # [Np, GL] f32
        i = jax.nn.sigmoid(gates[:, 0 * Hd:1 * Hd])
        f = jax.nn.sigmoid(gates[:, 1 * Hd:2 * Hd])
        g = jnp.tanh(gates[:, 2 * Hd:3 * Hd])
        o = jax.nn.sigmoid(gates[:, 3 * Hd:4 * Hd])
        c = f * c + i * g
        h = o * jnp.tanh(c)

    # Output head on the final hidden state: relu(h_T) @ W_out + b_out.
    out_ref[...] = (jnp.dot(jnp.maximum(h, 0.0).astype(jnp.bfloat16),
                            wout_ref[...],
                            preferred_element_type=jnp.float32)
                    + bout_ref[...])


# ------------------------------- JAX glue ------------------------------------

def _round_up(x, m):
    return (x + m - 1) // m * m


def _pad2(x, rows, cols):
    return jnp.pad(x, ((0, rows - x.shape[0]), (0, cols - x.shape[1])))


def hypergraph_factors(hyperedge_index, num_nodes, num_edges):
    """Factored propagation operands (H, Dinv, Binv) from hyperedge_index [2, nnz].

    A_t = D^{-1} H B^{-1} H^T is never materialized.
    TODO(synk): duplicate (node, edge) entries are collapsed by .set(1.0);
    PyG-style scatter-add would count multiplicity in the degrees.
    """
    node_idx = hyperedge_index[0]
    edge_idx = hyperedge_index[1]
    H = jnp.zeros((num_nodes, num_edges), jnp.float32).at[node_idx, edge_idx].set(1.0)
    D = H.sum(axis=1)
    B = H.sum(axis=0)
    Dinv = jnp.where(D > 0, 1.0 / D, 0.0)
    Binv = jnp.where(B > 0, 1.0 / B, 0.0)
    return H, Dinv, Binv


def multiscale_fedgnn_forward(params, H_seq, Dinv_seq, Binv_seq):
    T, N, E = H_seq.shape
    D = params['theta1'].shape[1]
    Hd = params['w_hh'].shape[0]
    C = params['w_out'].shape[1]

    LANE = 128
    Np = _round_up(N, 16)            # node (sublane) dim, bf16 pack quantum
    Ep = _round_up(E, LANE)          # hyperedge lanes of H
    Dp = _round_up(D, LANE)          # feature lanes
    GL = _round_up(4 * Hd, LANE)     # packed i|f|g|o gate lanes (single slab)
    Cp = _round_up(C, LANE)          # class lanes (unmasked lane-dense store)

    # Hoisted, time-invariant first projection: X @ Theta1 (computed once, f32).
    xp = (params['usr_emb'].astype(jnp.float32)
          @ params['theta1'].astype(jnp.float32))

    # Padded operands: matmul operands bf16 (H stays exact 0/1), scalings/biases f32.
    h_p = jnp.pad(H_seq, ((0, 0), (0, Np - N), (0, Ep - E))).astype(jnp.bfloat16)
    ht_p = jnp.transpose(h_p, (0, 2, 1))                                  # [T, Ep, Np]
    dinv_p = jnp.pad(Dinv_seq, ((0, 0), (0, Np - N)))[..., None].astype(jnp.float32)
    binv_p = jnp.pad(Binv_seq, ((0, 0), (0, Ep - E)))[..., None].astype(jnp.float32)
    xp_p = _pad2(xp, Np, Dp).astype(jnp.bfloat16)
    b1_p = _pad2(params['b1'], 1, Dp).astype(jnp.float32)
    th2_p = _pad2(params['theta2'], Dp, Dp).astype(jnp.bfloat16)
    b2_p = _pad2(params['b2'], 1, Dp).astype(jnp.float32)
    wih_p = _pad2(params['w_ih'], Dp, GL).astype(jnp.bfloat16)    # gates stay packed
    whh_p = _pad2(params['w_hh'], Hd, GL).astype(jnp.bfloat16)
    bl_p = _pad2(params['b_lstm'], 1, GL).astype(jnp.float32)
    wout_p = _pad2(params['w_out'], Hd, Cp).astype(jnp.bfloat16)
    bout_p = _pad2(params['b_out'], 1, Cp).astype(jnp.float32)

    # No grid: every operand is resident in VMEM for a single invocation
    # (total footprint here is a few hundred KiB), the time loop is unrolled
    # inside the kernel. See TODO at the top for the row-tiled grid variant.
    vmem = pl.BlockSpec(memory_space=pltpu.MemorySpace.VMEM)
    out_p = pl.pallas_call(
        fused_gnn_lstm_kernel,
        out_shape=jax.ShapeDtypeStruct((Np, Cp), jnp.float32),
        in_specs=[vmem] * 13,
        out_specs=vmem,
    )(h_p, ht_p, dinv_p, binv_p, xp_p, b1_p, th2_p, b2_p,
      wih_p, whh_p, bl_p, wout_p, bout_p)

    return out_p[:N, :C]


def reference_forward(params, H_seq, Dinv_seq, Binv_seq, matmul_dtype=jnp.float32):
    """Pure-JAX reference replicating the PyTorch forward semantics.

    matmul_dtype=jnp.bfloat16 mirrors the kernel's operand casts (f32
    accumulation, f32 degree scalings) for a tight numerical check;
    jnp.float32 is the exact module semantics.
    """
    md = matmul_dtype
    Hd = params['w_hh'].shape[0]
    N = H_seq.shape[1]

    def mm(a, b):
        return jnp.dot(a.astype(md), b.astype(md),
                       preferred_element_type=jnp.float32)

    xp = (params['usr_emb'].astype(jnp.float32)
          @ params['theta1'].astype(jnp.float32))           # hoisted (as wrapper)
    h = jnp.zeros((N, Hd), jnp.float32)
    c = jnp.zeros((N, Hd), jnp.float32)
    for t in range(H_seq.shape[0]):
        Ht = H_seq[t]
        dinv = Dinv_seq[t][:, None]
        binv = Binv_seq[t][:, None]

        def prop(x):
            s = mm(Ht.T, x) * binv
            return mm(Ht, s) * dinv

        x1 = jax.nn.relu(prop(xp) + params['b1'])
        x2 = jax.nn.relu(prop(mm(x1, params['theta2'])) + params['b2'])
        gates = mm(x2, params['w_ih']) + mm(h, params['w_hh']) + params['b_lstm']
        i = jax.nn.sigmoid(gates[:, :Hd])
        f = jax.nn.sigmoid(gates[:, Hd:2 * Hd])
        g = jnp.tanh(gates[:, 2 * Hd:3 * Hd])
        o = jax.nn.sigmoid(gates[:, 3 * Hd:])
        c = f * c + i * g
        h = o * jnp.tanh(c)
    return mm(jax.nn.relu(h), params['w_out']) + params['b_out']


# --------------------------------- main ---------------------------------------

if __name__ == "__main__":
    usr_num = 16       # number of users (nodes / LSTM "batch")
    usr_dim = 32       # usr_dim == usr_dim1 (hyperconv in/out channels)
    hid_dim = 16       # usr_dim2 (LSTM hidden)
    class_num = 2
    T = 4              # len(hyperedge_seq)
    n_edges = 8        # hyperedges per timestep
    nnz = 24           # incidence entries per timestep

    key = jax.random.PRNGKey(0)
    keys = jax.random.split(key, 12)

    params = {
        'usr_emb': jax.random.normal(keys[0], (usr_num, usr_dim), jnp.float32),
        'theta1':  0.2 * jax.random.normal(keys[1], (usr_dim, usr_dim), jnp.float32),
        'b1':      0.1 * jax.random.normal(keys[2], (1, usr_dim), jnp.float32),
        'theta2':  0.2 * jax.random.normal(keys[3], (usr_dim, usr_dim), jnp.float32),
        'b2':      0.1 * jax.random.normal(keys[4], (1, usr_dim), jnp.float32),
        # LSTM params as [in, 4*hid] / [hid, 4*hid]; gate order i, f, g, o.
        'w_ih':    0.2 * jax.random.normal(keys[5], (usr_dim, 4 * hid_dim), jnp.float32),
        'w_hh':    0.2 * jax.random.normal(keys[6], (hid_dim, 4 * hid_dim), jnp.float32),
        'b_lstm':  0.1 * jax.random.normal(keys[7], (1, 4 * hid_dim), jnp.float32),
        'w_out':   0.2 * jax.random.normal(keys[8], (hid_dim, class_num), jnp.float32),
        'b_out':   0.1 * jax.random.normal(keys[9], (1, class_num), jnp.float32),
    }

    # Synthetic hyperedge_seq: T hyperedge_index arrays of shape [2, nnz],
    # converted to factored propagation operands (H, Dinv, Binv) per timestep.
    node_idx = jax.random.randint(keys[10], (T, nnz), 0, usr_num)
    edge_idx = jax.random.randint(keys[11], (T, nnz), 0, n_edges)
    Hs, Ds, Bs = [], [], []
    for t in range(T):
        Hm, Dinv, Binv = hypergraph_factors(
            jnp.stack([node_idx[t], edge_idx[t]]), usr_num, n_edges)
        Hs.append(Hm); Ds.append(Dinv); Bs.append(Binv)
    H_seq = jnp.stack(Hs)        # [T, N, E]
    Dinv_seq = jnp.stack(Ds)     # [T, N]
    Binv_seq = jnp.stack(Bs)     # [T, E]

    out = multiscale_fedgnn_forward(params, H_seq, Dinv_seq, Binv_seq)
    out = jax.block_until_ready(out)
    assert out.shape == (usr_num, class_num)

    # Tight check vs. a reference mirroring the kernel's bf16-operand /
    # f32-accumulation / f32-scaling cast pattern.
    ref_bf16 = reference_forward(params, H_seq, Dinv_seq, Binv_seq,
                                 matmul_dtype=jnp.bfloat16)
    assert jnp.allclose(out, ref_bf16, atol=3e-3, rtol=3e-3), "mismatch vs bf16 reference"

    # Looser check vs. the exact f32 module-semantics reference (difference is
    # purely the deliberate bf16 operand rounding).
    ref_f32 = reference_forward(params, H_seq, Dinv_seq, Binv_seq,
                                matmul_dtype=jnp.float32)
    assert jnp.allclose(out, ref_f32, atol=1e-1, rtol=1e-1), "mismatch vs f32 reference"

    print("KERNEL_OK")
</pallas_src>

<mosaic_0001>
module attributes {stable_mosaic.version = 11 : i64} {
  func.func @fused_gnn_lstm_kernel(%arg0: memref<4x16x128xbf16, #tpu.memory_space<vmem>>, %arg1: memref<4x128x16xbf16, #tpu.memory_space<vmem>>, %arg2: memref<4x16x1xf32, #tpu.memory_space<vmem>>, %arg3: memref<4x128x1xf32, #tpu.memory_space<vmem>>, %arg4: memref<16x128xbf16, #tpu.memory_space<vmem>>, %arg5: memref<1x128xf32, #tpu.memory_space<vmem>>, %arg6: memref<128x128xbf16, #tpu.memory_space<vmem>>, %arg7: memref<1x128xf32, #tpu.memory_space<vmem>>, %arg8: memref<128x128xbf16, #tpu.memory_space<vmem>>, %arg9: memref<16x128xbf16, #tpu.memory_space<vmem>>, %arg10: memref<1x128xf32, #tpu.memory_space<vmem>>, %arg11: memref<16x128xbf16, #tpu.memory_space<vmem>>, %arg12: memref<1x128xf32, #tpu.memory_space<vmem>>, %arg13: memref<16x128xf32, #tpu.memory_space<vmem>>) attributes {dimension_semantics = [], scalar_prefetch = 0 : i64, scratch_operands = 0 : i64, tpu.core_type = #tpu.core_type<tc>} {
    %c0 = arith.constant 0 : index
    %c0_0 = arith.constant 0 : index
    %0 = vector.load %arg4[%c0, %c0_0] : memref<16x128xbf16, #tpu.memory_space<vmem>>, vector<16x128xbf16>
    %c0_1 = arith.constant 0 : index
    %c0_2 = arith.constant 0 : index
    %1 = vector.load %arg6[%c0_1, %c0_2] : memref<128x128xbf16, #tpu.memory_space<vmem>>, vector<128x128xbf16>
    %c0_3 = arith.constant 0 : index
    %c0_4 = arith.constant 0 : index
    %2 = vector.load %arg8[%c0_3, %c0_4] : memref<128x128xbf16, #tpu.memory_space<vmem>>, vector<128x128xbf16>
    %c0_5 = arith.constant 0 : index
    %c0_6 = arith.constant 0 : index
    %3 = vector.load %arg9[%c0_5, %c0_6] : memref<16x128xbf16, #tpu.memory_space<vmem>>, vector<16x128xbf16>
    %c0_7 = arith.constant 0 : index
    %c0_8 = arith.constant 0 : index
    %4 = vector.load %arg5[%c0_7, %c0_8] : memref<1x128xf32, #tpu.memory_space<vmem>>, vector<1x128xf32>
    %c0_9 = arith.constant 0 : index
    %c0_10 = arith.constant 0 : index
    %5 = vector.load %arg7[%c0_9, %c0_10] : memref<1x128xf32, #tpu.memory_space<vmem>>, vector<1x128xf32>
    %c0_11 = arith.constant 0 : index
    %c0_12 = arith.constant 0 : index
    %6 = vector.load %arg10[%c0_11, %c0_12] : memref<1x128xf32, #tpu.memory_space<vmem>>, vector<1x128xf32>
    %cst = arith.constant 0.000000e+00 : f32
    %7 = vector.broadcast %cst : f32 to vector<16x16xf32>
    %cst_13 = arith.constant 0.000000e+00 : f32
    %8 = vector.broadcast %cst_13 : f32 to vector<16x16xf32>
    %c0_14 = arith.constant 0 : index
    %c0_15 = arith.constant 0 : index
    %c0_16 = arith.constant 0 : index
    %9 = vector.load %arg0[%c0_14, %c0_15, %c0_16] : memref<4x16x128xbf16, #tpu.memory_space<vmem>>, vector<1x16x128xbf16>
    %10 = vector.shape_cast %9 : vector<1x16x128xbf16> to vector<16x128xbf16>
    %c0_17 = arith.constant 0 : index
    %c0_18 = arith.constant 0 : index
    %c0_19 = arith.constant 0 : index
    %11 = vector.load %arg1[%c0_17, %c0_18, %c0_19] : memref<4x128x16xbf16, #tpu.memory_space<vmem>>, vector<1x128x16xbf16>
    %12 = vector.shape_cast %11 : vector<1x128x16xbf16> to vector<128x16xbf16>
    %c0_20 = arith.constant 0 : index
    %c0_21 = arith.constant 0 : index
    %c0_22 = arith.constant 0 : index
    %13 = vector.load %arg2[%c0_20, %c0_21, %c0_22] : memref<4x16x1xf32, #tpu.memory_space<vmem>>, vector<1x16x1xf32>
    %14 = vector.shape_cast %13 : vector<1x16x1xf32> to vector<16x1xf32>
    %c0_23 = arith.constant 0 : index
    %c0_24 = arith.constant 0 : index
    %c0_25 = arith.constant 0 : index
    %15 = vector.load %arg3[%c0_23, %c0_24, %c0_25] : memref<4x128x1xf32, #tpu.memory_space<vmem>>, vector<1x128x1xf32>
    %16 = vector.shape_cast %15 : vector<1x128x1xf32> to vector<128x1xf32>
    %cst_26 = arith.constant dense<0.000000e+00> : vector<128x128xf32>
    %17 = tpu.matmul %12, %0, %cst_26 {dimension_numbers = #tpu.dot_dimension_numbers<[1], [0], [0], [1], [0, 0, 1, 1], [], []>} : vector<128x16xbf16>, vector<16x128xbf16>, vector<128x128xf32> -> vector<128x128xf32>
    %18 = vector.broadcast %16 : vector<128x1xf32> to vector<128x128xf32>
    %19 = arith.mulf %17, %18 : vector<128x128xf32>
    %20 = arith.truncf %19 : vector<128x128xf32> to vector<128x128xbf16>
    %cst_27 = arith.constant dense<0.000000e+00> : vector<16x128xf32>
    %21 = tpu.matmul %10, %20, %cst_27 {dimension_numbers = #tpu.dot_dimension_numbers<[1], [0], [0], [1], [0, 0, 1, 1], [], []>} : vector<16x128xbf16>, vector<128x128xbf16>, vector<16x128xf32> -> vector<16x128xf32>
    %22 = vector.broadcast %14 : vector<16x1xf32> to vector<16x128xf32>
    %23 = arith.mulf %21, %22 : vector<16x128xf32>
    %24 = vector.broadcast %4 : vector<1x128xf32> to vector<16x128xf32>
    %25 = arith.addf %23, %24 : vector<16x128xf32>
    %cst_28 = arith.constant 0.000000e+00 : f32
    %26 = vector.broadcast %cst_28 : f32 to vector<16x128xf32>
    %27 = arith.maximumf %25, %26 : vector<16x128xf32>
    %28 = arith.truncf %27 : vector<16x128xf32> to vector<16x128xbf16>
    %cst_29 = arith.constant dense<0.000000e+00> : vector<16x128xf32>
    %29 = tpu.matmul %28, %1, %cst_29 {dimension_numbers = #tpu.dot_dimension_numbers<[1], [0], [0], [1], [0, 0, 1, 1], [], []>} : vector<16x128xbf16>, vector<128x128xbf16>, vector<16x128xf32> -> vector<16x128xf32>
    %30 = arith.truncf %29 : vector<16x128xf32> to vector<16x128xbf16>
    %cst_30 = arith.constant dense<0.000000e+00> : vector<128x128xf32>
    %31 = tpu.matmul %12, %30, %cst_30 {dimension_numbers = #tpu.dot_dimension_numbers<[1], [0], [0], [1], [0, 0, 1, 1], [], []>} : vector<128x16xbf16>, vector<16x128xbf16>, vector<128x128xf32> -> vector<128x128xf32>
    %32 = vector.broadcast %16 : vector<128x1xf32> to vector<128x128xf32>
    %33 = arith.mulf %31, %32 : vector<128x128xf32>
    %34 = arith.truncf %33 : vector<128x128xf32> to vector<128x128xbf16>
    %cst_31 = arith.constant dense<0.000000e+00> : vector<16x128xf32>
    %35 = tpu.matmul %10, %34, %cst_31 {dimension_numbers = #tpu.dot_dimension_numbers<[1], [0], [0], [1], [0, 0, 1, 1], [], []>} : vector<16x128xbf16>, vector<128x128xbf16>, vector<16x128xf32> -> vector<16x128xf32>
    %36 = vector.broadcast %14 : vector<16x1xf32> to vector<16x128xf32>
    %37 = arith.mulf %35, %36 : vector<16x128xf32>
    %38 = vector.broadcast %5 : vector<1x128xf32> to vector<16x128xf32>
    %39 = arith.addf %37, %38 : vector<16x128xf32>
    %cst_32 = arith.constant 0.000000e+00 : f32
    %40 = vector.broadcast %cst_32 : f32 to vector<16x128xf32>
    %41 = arith.maximumf %39, %40 : vector<16x128xf32>
    %42 = arith.truncf %41 : vector<16x128xf32> to vector<16x128xbf16>
    %cst_33 = arith.constant dense<0.000000e+00> : vector<16x128xf32>
    %43 = tpu.matmul %42, %2, %cst_33 {dimension_numbers = #tpu.dot_dimension_numbers<[1], [0], [0], [1], [0, 0, 1, 1], [], []>} : vector<16x128xbf16>, vector<128x128xbf16>, vector<16x128xf32> -> vector<16x128xf32>
    %44 = arith.truncf %7 : vector<16x16xf32> to vector<16x16xbf16>
    %cst_34 = arith.constant dense<0.000000e+00> : vector<16x128xf32>
    %45 = tpu.matmul %44, %3, %cst_34 {dimension_numbers = #tpu.dot_dimension_numbers<[1], [0], [0], [1], [0, 0, 1, 1], [], []>} : vector<16x16xbf16>, vector<16x128xbf16>, vector<16x128xf32> -> vector<16x128xf32>
    %46 = arith.addf %43, %45 : vector<16x128xf32>
    %47 = vector.broadcast %6 : vector<1x128xf32> to vector<16x128xf32>
    %48 = arith.addf %46, %47 : vector<16x128xf32>
    %49 = vector.extract_strided_slice %48 {offsets = [0, 0], sizes = [16, 16], strides = [1, 1]} : vector<16x128xf32> to vector<16x16xf32>
    %50 = arith.negf %49 : vector<16x16xf32>
    %51 = math.exp %50 : vector<16x16xf32>
    %cst_35 = arith.constant 1.000000e+00 : f32
    %52 = vector.broadcast %cst_35 : f32 to vector<16x16xf32>
    %53 = arith.addf %52, %51 : vector<16x16xf32>
    %54 = arith.divf %52, %53 : vector<16x16xf32>
    %55 = vector.extract_strided_slice %48 {offsets = [0, 16], sizes = [16, 16], strides = [1, 1]} : vector<16x128xf32> to vector<16x16xf32>
    %56 = arith.negf %55 : vector<16x16xf32>
    %57 = math.exp %56 : vector<16x16xf32>
    %cst_36 = arith.constant 1.000000e+00 : f32
    %58 = vector.broadcast %cst_36 : f32 to vector<16x16xf32>
    %59 = arith.addf %58, %57 : vector<16x16xf32>
    %60 = arith.divf %58, %59 : vector<16x16xf32>
    %61 = vector.extract_strided_slice %48 {offsets = [0, 32], sizes = [16, 16], strides = [1, 1]} : vector<16x128xf32> to vector<16x16xf32>
    %62 = math.tanh %61 : vector<16x16xf32>
    %63 = vector.extract_strided_slice %48 {offsets = [0, 48], sizes = [16, 16], strides = [1, 1]} : vector<16x128xf32> to vector<16x16xf32>
    %64 = arith.negf %63 : vector<16x16xf32>
    %65 = math.exp %64 : vector<16x16xf32>
    %cst_37 = arith.constant 1.000000e+00 : f32
    %66 = vector.broadcast %cst_37 : f32 to vector<16x16xf32>
    %67 = arith.addf %66, %65 : vector<16x16xf32>
    %68 = arith.divf %66, %67 : vector<16x16xf32>
    %69 = arith.mulf %60, %8 : vector<16x16xf32>
    %70 = arith.mulf %54, %62 : vector<16x16xf32>
    %71 = arith.addf %69, %70 : vector<16x16xf32>
    %72 = math.tanh %71 : vector<16x16xf32>
    %73 = arith.mulf %68, %72 : vector<16x16xf32>
    %c1 = arith.constant 1 : index
    %c0_38 = arith.constant 0 : index
    %c0_39 = arith.constant 0 : index
    %74 = vector.load %arg0[%c1, %c0_38, %c0_39] : memref<4x16x128xbf16, #tpu.memory_space<vmem>>, vector<1x16x128xbf16>
    %75 = vector.shape_cast %74 : vector<1x16x128xbf16> to vector<16x128xbf16>
    %c1_40 = arith.constant 1 : index
    %c0_41 = arith.constant 0 : index
    %c0_42 = arith.constant 0 : index
    %76 = vector.load %arg1[%c1_40, %c0_41, %c0_42] : memref<4x128x16xbf16, #tpu.memory_space<vmem>>, vector<1x128x16xbf16>
    %77 = vector.shape_cast %76 : vector<1x128x16xbf16> to vector<128x16xbf16>
    %c1_43 = arith.constant 1 : index
    %c0_44 = arith.constant 0 : index
    %c0_45 = arith.constant 0 : index
    %78 = vector.load %arg2[%c1_43, %c0_44, %c0_45] : memref<4x16x1xf32, #tpu.memory_space<vmem>>, vector<1x16x1xf32>
    %79 = vector.shape_cast %78 : vector<1x16x1xf32> to vector<16x1xf32>
    %c1_46 = arith.constant 1 : index
    %c0_47 = arith.constant 0 : index
    %c0_48 = arith.constant 0 : index
    %80 = vector.load %arg3[%c1_46, %c0_47, %c0_48] : memref<4x128x1xf32, #tpu.memory_space<vmem>>, vector<1x128x1xf32>
    %81 = vector.shape_cast %80 : vector<1x128x1xf32> to vector<128x1xf32>
    %cst_49 = arith.constant dense<0.000000e+00> : vector<128x128xf32>
    %82 = tpu.matmul %77, %0, %cst_49 {dimension_numbers = #tpu.dot_dimension_numbers<[1], [0], [0], [1], [0, 0, 1, 1], [], []>} : vector<128x16xbf16>, vector<16x128xbf16>, vector<128x128xf32> -> vector<128x128xf32>
    %83 = vector.broadcast %81 : vector<128x1xf32> to vector<128x128xf32>
    %84 = arith.mulf %82, %83 : vector<128x128xf32>
    %85 = arith.truncf %84 : vector<128x128xf32> to vector<128x128xbf16>
    %cst_50 = arith.constant dense<0.000000e+00> : vector<16x128xf32>
    %86 = tpu.matmul %75, %85, %cst_50 {dimension_numbers = #tpu.dot_dimension_numbers<[1], [0], [0], [1], [0, 0, 1, 1], [], []>} : vector<16x128xbf16>, vector<128x128xbf16>, vector<16x128xf32> -> vector<16x128xf32>
    %87 = vector.broadcast %79 : vector<16x1xf32> to vector<16x128xf32>
    %88 = arith.mulf %86, %87 : vector<16x128xf32>
    %89 = vector.broadcast %4 : vector<1x128xf32> to vector<16x128xf32>
    %90 = arith.addf %88, %89 : vector<16x128xf32>
    %cst_51 = arith.constant 0.000000e+00 : f32
    %91 = vector.broadcast %cst_51 : f32 to vector<16x128xf32>
    %92 = arith.maximumf %90, %91 : vector<16x128xf32>
    %93 = arith.truncf %92 : vector<16x128xf32> to vector<16x128xbf16>
    %cst_52 = arith.constant dense<0.000000e+00> : vector<16x128xf32>
    %94 = tpu.matmul %93, %1, %cst_52 {dimension_numbers = #tpu.dot_dimension_numbers<[1], [0], [0], [1], [0, 0, 1, 1], [], []>} : vector<16x128xbf16>, vector<128x128xbf16>, vector<16x128xf32> -> vector<16x128xf32>
    %95 = arith.truncf %94 : vector<16x128xf32> to vector<16x128xbf16>
    %cst_53 = arith.constant dense<0.000000e+00> : vector<128x128xf32>
    %96 = tpu.matmul %77, %95, %cst_53 {dimension_numbers = #tpu.dot_dimension_numbers<[1], [0], [0], [1], [0, 0, 1, 1], [], []>} : vector<128x16xbf16>, vector<16x128xbf16>, vector<128x128xf32> -> vector<128x128xf32>
    %97 = vector.broadcast %81 : vector<128x1xf32> to vector<128x128xf32>
    %98 = arith.mulf %96, %97 : vector<128x128xf32>
    %99 = arith.truncf %98 : vector<128x128xf32> to vector<128x128xbf16>
    %cst_54 = arith.constant dense<0.000000e+00> : vector<16x128xf32>
    %100 = tpu.matmul %75, %99, %cst_54 {dimension_numbers = #tpu.dot_dimension_numbers<[1], [0], [0], [1], [0, 0, 1, 1], [], []>} : vector<16x128xbf16>, vector<128x128xbf16>, vector<16x128xf32> -> vector<16x128xf32>
    %101 = vector.broadcast %79 : vector<16x1xf32> to vector<16x128xf32>
    %102 = arith.mulf %100, %101 : vector<16x128xf32>
    %103 = vector.broadcast %5 : vector<1x128xf32> to vector<16x128xf32>
    %104 = arith.addf %102, %103 : vector<16x128xf32>
    %cst_55 = arith.constant 0.000000e+00 : f32
    %105 = vector.broadcast %cst_55 : f32 to vector<16x128xf32>
    %106 = arith.maximumf %104, %105 : vector<16x128xf32>
    %107 = arith.truncf %106 : vector<16x128xf32> to vector<16x128xbf16>
    %cst_56 = arith.constant dense<0.000000e+00> : vector<16x128xf32>
    %108 = tpu.matmul %107, %2, %cst_56 {dimension_numbers = #tpu.dot_dimension_numbers<[1], [0], [0], [1], [0, 0, 1, 1], [], []>} : vector<16x128xbf16>, vector<128x128xbf16>, vector<16x128xf32> -> vector<16x128xf32>
    %109 = arith.truncf %73 : vector<16x16xf32> to vector<16x16xbf16>
    %cst_57 = arith.constant dense<0.000000e+00> : vector<16x128xf32>
    %110 = tpu.matmul %109, %3, %cst_57 {dimension_numbers = #tpu.dot_dimension_numbers<[1], [0], [0], [1], [0, 0, 1, 1], [], []>} : vector<16x16xbf16>, vector<16x128xbf16>, vector<16x128xf32> -> vector<16x128xf32>
    %111 = arith.addf %108, %110 : vector<16x128xf32>
    %112 = vector.broadcast %6 : vector<1x128xf32> to vector<16x128xf32>
    %113 = arith.addf %111, %112 : vector<16x128xf32>
    %114 = vector.extract_strided_slice %113 {offsets = [0, 0], sizes = [16, 16], strides = [1, 1]} : vector<16x128xf32> to vector<16x16xf32>
    %115 = arith.negf %114 : vector<16x16xf32>
    %116 = math.exp %115 : vector<16x16xf32>
    %cst_58 = arith.constant 1.000000e+00 : f32
    %117 = vector.broadcast %cst_58 : f32 to vector<16x16xf32>
    %118 = arith.addf %117, %116 : vector<16x16xf32>
    %119 = arith.divf %117, %118 : vector<16x16xf32>
    %120 = vector.extract_strided_slice %113 {offsets = [0, 16], sizes = [16, 16], strides = [1, 1]} : vector<16x128xf32> to vector<16x16xf32>
    %121 = arith.negf %120 : vector<16x16xf32>
    %122 = math.exp %121 : vector<16x16xf32>
    %cst_59 = arith.constant 1.000000e+00 : f32
    %123 = vector.broadcast %cst_59 : f32 to vector<16x16xf32>
    %124 = arith.addf %123, %122 : vector<16x16xf32>
    %125 = arith.divf %123, %124 : vector<16x16xf32>
    %126 = vector.extract_strided_slice %113 {offsets = [0, 32], sizes = [16, 16], strides = [1, 1]} : vector<16x128xf32> to vector<16x16xf32>
    %127 = math.tanh %126 : vector<16x16xf32>
    %128 = vector.extract_strided_slice %113 {offsets = [0, 48], sizes = [16, 16], strides = [1, 1]} : vector<16x128xf32> to vector<16x16xf32>
    %129 = arith.negf %128 : vector<16x16xf32>
    %130 = math.exp %129 : vector<16x16xf32>
    %cst_60 = arith.constant 1.000000e+00 : f32
    %131 = vector.broadcast %cst_60 : f32 to vector<16x16xf32>
    %132 = arith.addf %131, %130 : vector<16x16xf32>
    %133 = arith.divf %131, %132 : vector<16x16xf32>
    %134 = arith.mulf %125, %71 : vector<16x16xf32>
    %135 = arith.mulf %119, %127 : vector<16x16xf32>
    %136 = arith.addf %134, %135 : vector<16x16xf32>
    %137 = math.tanh %136 : vector<16x16xf32>
    %138 = arith.mulf %133, %137 : vector<16x16xf32>
    %c2 = arith.constant 2 : index
    %c0_61 = arith.constant 0 : index
    %c0_62 = arith.constant 0 : index
    %139 = vector.load %arg0[%c2, %c0_61, %c0_62] : memref<4x16x128xbf16, #tpu.memory_space<vmem>>, vector<1x16x128xbf16>
    %140 = vector.shape_cast %139 : vector<1x16x128xbf16> to vector<16x128xbf16>
    %c2_63 = arith.constant 2 : index
    %c0_64 = arith.constant 0 : index
    %c0_65 = arith.constant 0 : index
    %141 = vector.load %arg1[%c2_63, %c0_64, %c0_65] : memref<4x128x16xbf16, #tpu.memory_space<vmem>>, vector<1x128x16xbf16>
    %142 = vector.shape_cast %141 : vector<1x128x16xbf16> to vector<128x16xbf16>
    %c2_66 = arith.constant 2 : index
    %c0_67 = arith.constant 0 : index
    %c0_68 = arith.constant 0 : index
    %143 = vector.load %arg2[%c2_66, %c0_67, %c0_68] : memref<4x16x1xf32, #tpu.memory_space<vmem>>, vector<1x16x1xf32>
    %144 = vector.shape_cast %143 : vector<1x16x1xf32> to vector<16x1xf32>
    %c2_69 = arith.constant 2 : index
    %c0_70 = arith.constant 0 : index
    %c0_71 = arith.constant 0 : index
    %145 = vector.load %arg3[%c2_69, %c0_70, %c0_71] : memref<4x128x1xf32, #tpu.memory_space<vmem>>, vector<1x128x1xf32>
    %146 = vector.shape_cast %145 : vector<1x128x1xf32> to vector<128x1xf32>
    %cst_72 = arith.constant dense<0.000000e+00> : vector<128x128xf32>
    %147 = tpu.matmul %142, %0, %cst_72 {dimension_numbers = #tpu.dot_dimension_numbers<[1], [0], [0], [1], [0, 0, 1, 1], [], []>} : vector<128x16xbf16>, vector<16x128xbf16>, vector<128x128xf32> -> vector<128x128xf32>
    %148 = vector.broadcast %146 : vector<128x1xf32> to vector<128x128xf32>
    %149 = arith.mulf %147, %148 : vector<128x128xf32>
    %150 = arith.truncf %149 : vector<128x128xf32> to vector<128x128xbf16>
    %cst_73 = arith.constant dense<0.000000e+00> : vector<16x128xf32>
    %151 = tpu.matmul %140, %150, %cst_73 {dimension_numbers = #tpu.dot_dimension_numbers<[1], [0], [0], [1], [0, 0, 1, 1], [], []>} : vector<16x128xbf16>, vector<128x128xbf16>, vector<16x128xf32> -> vector<16x128xf32>
    %152 = vector.broadcast %144 : vector<16x1xf32> to vector<16x128xf32>
    %153 = arith.mulf %151, %152 : vector<16x128xf32>
    %154 = vector.broadcast %4 : vector<1x128xf32> to vector<16x128xf32>
    %155 = arith.addf %153, %154 : vector<16x128xf32>
    %cst_74 = arith.constant 0.000000e+00 : f32
    %156 = vector.broadcast %cst_74 : f32 to vector<16x128xf32>
    %157 = arith.maximumf %155, %156 : vector<16x128xf32>
    %158 = arith.truncf %157 : vector<16x128xf32> to vector<16x128xbf16>
    %cst_75 = arith.constant dense<0.000000e+00> : vector<16x128xf32>
    %159 = tpu.matmul %158, %1, %cst_75 {dimension_numbers = #tpu.dot_dimension_numbers<[1], [0], [0], [1], [0, 0, 1, 1], [], []>} : vector<16x128xbf16>, vector<128x128xbf16>, vector<16x128xf32> -> vector<16x128xf32>
    %160 = arith.truncf %159 : vector<16x128xf32> to vector<16x128xbf16>
    %cst_76 = arith.constant dense<0.000000e+00> : vector<128x128xf32>
    %161 = tpu.matmul %142, %160, %cst_76 {dimension_numbers = #tpu.dot_dimension_numbers<[1], [0], [0], [1], [0, 0, 1, 1], [], []>} : vector<128x16xbf16>, vector<16x128xbf16>, vector<128x128xf32> -> vector<128x128xf32>
    %162 = vector.broadcast %146 : vector<128x1xf32> to vector<128x128xf32>
    %163 = arith.mulf %161, %162 : vector<128x128xf32>
    %164 = arith.truncf %163 : vector<128x128xf32> to vector<128x128xbf16>
    %cst_77 = arith.constant dense<0.000000e+00> : vector<16x128xf32>
    %165 = tpu.matmul %140, %164, %cst_77 {dimension_numbers = #tpu.dot_dimension_numbers<[1], [0], [0], [1], [0, 0, 1, 1], [], []>} : vector<16x128xbf16>, vector<128x128xbf16>, vector<16x128xf32> -> vector<16x128xf32>
    %166 = vector.broadcast %144 : vector<16x1xf32> to vector<16x128xf32>
    %167 = arith.mulf %165, %166 : vector<16x128xf32>
    %168 = vector.broadcast %5 : vector<1x128xf32> to vector<16x128xf32>
    %169 = arith.addf %167, %168 : vector<16x128xf32>
    %cst_78 = arith.constant 0.000000e+00 : f32
    %170 = vector.broadcast %cst_78 : f32 to vector<16x128xf32>
    %171 = arith.maximumf %169, %170 : vector<16x128xf32>
    %172 = arith.truncf %171 : vector<16x128xf32> to vector<16x128xbf16>
    %cst_79 = arith.constant dense<0.000000e+00> : vector<16x128xf32>
    %173 = tpu.matmul %172, %2, %cst_79 {dimension_numbers = #tpu.dot_dimension_numbers<[1], [0], [0], [1], [0, 0, 1, 1], [], []>} : vector<16x128xbf16>, vector<128x128xbf16>, vector<16x128xf32> -> vector<16x128xf32>
    %174 = arith.truncf %138 : vector<16x16xf32> to vector<16x16xbf16>
    %cst_80 = arith.constant dense<0.000000e+00> : vector<16x128xf32>
    %175 = tpu.matmul %174, %3, %cst_80 {dimension_numbers = #tpu.dot_dimension_numbers<[1], [0], [0], [1], [0, 0, 1, 1], [], []>} : vector<16x16xbf16>, vector<16x128xbf16>, vector<16x128xf32> -> vector<16x128xf32>
    %176 = arith.addf %173, %175 : vector<16x128xf32>
    %177 = vector.broadcast %6 : vector<1x128xf32> to vector<16x128xf32>
    %178 = arith.addf %176, %177 : vector<16x128xf32>
    %179 = vector.extract_strided_slice %178 {offsets = [0, 0], sizes = [16, 16], strides = [1, 1]} : vector<16x128xf32> to vector<16x16xf32>
    %180 = arith.negf %179 : vector<16x16xf32>
    %181 = math.exp %180 : vector<16x16xf32>
    %cst_81 = arith.constant 1.000000e+00 : f32
    %182 = vector.broadcast %cst_81 : f32 to vector<16x16xf32>
    %183 = arith.addf %182, %181 : vector<16x16xf32>
    %184 = arith.divf %182, %183 : vector<16x16xf32>
    %185 = vector.extract_strided_slice %178 {offsets = [0, 16], sizes = [16, 16], strides = [1, 1]} : vector<16x128xf32> to vector<16x16xf32>
    %186 = arith.negf %185 : vector<16x16xf32>
    %187 = math.exp %186 : vector<16x16xf32>
    %cst_82 = arith.constant 1.000000e+00 : f32
    %188 = vector.broadcast %cst_82 : f32 to vector<16x16xf32>
    %189 = arith.addf %188, %187 : vector<16x16xf32>
    %190 = arith.divf %188, %189 : vector<16x16xf32>
    %191 = vector.extract_strided_slice %178 {offsets = [0, 32], sizes = [16, 16], strides = [1, 1]} : vector<16x128xf32> to vector<16x16xf32>
    %192 = math.tanh %191 : vector<16x16xf32>
    %193 = vector.extract_strided_slice %178 {offsets = [0, 48], sizes = [16, 16], strides = [1, 1]} : vector<16x128xf32> to vector<16x16xf32>
    %194 = arith.negf %193 : vector<16x16xf32>
    %195 = math.exp %194 : vector<16x16xf32>
    %cst_83 = arith.constant 1.000000e+00 : f32
    %196 = vector.broadcast %cst_83 : f32 to vector<16x16xf32>
    %197 = arith.addf %196, %195 : vector<16x16xf32>
    %198 = arith.divf %196, %197 : vector<16x16xf32>
    %199 = arith.mulf %190, %136 : vector<16x16xf32>
    %200 = arith.mulf %184, %192 : vector<16x16xf32>
    %201 = arith.addf %199, %200 : vector<16x16xf32>
    %202 = math.tanh %201 : vector<16x16xf32>
    %203 = arith.mulf %198, %202 : vector<16x16xf32>
    %c3 = arith.constant 3 : index
    %c0_84 = arith.constant 0 : index
    %c0_85 = arith.constant 0 : index
    %204 = vector.load %arg0[%c3, %c0_84, %c0_85] : memref<4x16x128xbf16, #tpu.memory_space<vmem>>, vector<1x16x128xbf16>
    %205 = vector.shape_cast %204 : vector<1x16x128xbf16> to vector<16x128xbf16>
    %c3_86 = arith.constant 3 : index
    %c0_87 = arith.constant 0 : index
    %c0_88 = arith.constant 0 : index
    %206 = vector.load %arg1[%c3_86, %c0_87, %c0_88] : memref<4x128x16xbf16, #tpu.memory_space<vmem>>, vector<1x128x16xbf16>
    %207 = vector.shape_cast %206 : vector<1x128x16xbf16> to vector<128x16xbf16>
    %c3_89 = arith.constant 3 : index
    %c0_90 = arith.constant 0 : index
    %c0_91 = arith.constant 0 : index
    %208 = vector.load %arg2[%c3_89, %c0_90, %c0_91] : memref<4x16x1xf32, #tpu.memory_space<vmem>>, vector<1x16x1xf32>
    %209 = vector.shape_cast %208 : vector<1x16x1xf32> to vector<16x1xf32>
    %c3_92 = arith.constant 3 : index
    %c0_93 = arith.constant 0 : index
    %c0_94 = arith.constant 0 : index
    %210 = vector.load %arg3[%c3_92, %c0_93, %c0_94] : memref<4x128x1xf32, #tpu.memory_space<vmem>>, vector<1x128x1xf32>
    %211 = vector.shape_cast %210 : vector<1x128x1xf32> to vector<128x1xf32>
    %cst_95 = arith.constant dense<0.000000e+00> : vector<128x128xf32>
    %212 = tpu.matmul %207, %0, %cst_95 {dimension_numbers = #tpu.dot_dimension_numbers<[1], [0], [0], [1], [0, 0, 1, 1], [], []>} : vector<128x16xbf16>, vector<16x128xbf16>, vector<128x128xf32> -> vector<128x128xf32>
    %213 = vector.broadcast %211 : vector<128x1xf32> to vector<128x128xf32>
    %214 = arith.mulf %212, %213 : vector<128x128xf32>
    %215 = arith.truncf %214 : vector<128x128xf32> to vector<128x128xbf16>
    %cst_96 = arith.constant dense<0.000000e+00> : vector<16x128xf32>
    %216 = tpu.matmul %205, %215, %cst_96 {dimension_numbers = #tpu.dot_dimension_numbers<[1], [0], [0], [1], [0, 0, 1, 1], [], []>} : vector<16x128xbf16>, vector<128x128xbf16>, vector<16x128xf32> -> vector<16x128xf32>
    %217 = vector.broadcast %209 : vector<16x1xf32> to vector<16x128xf32>
    %218 = arith.mulf %216, %217 : vector<16x128xf32>
    %219 = vector.broadcast %4 : vector<1x128xf32> to vector<16x128xf32>
    %220 = arith.addf %218, %219 : vector<16x128xf32>
    %cst_97 = arith.constant 0.000000e+00 : f32
    %221 = vector.broadcast %cst_97 : f32 to vector<16x128xf32>
    %222 = arith.maximumf %220, %221 : vector<16x128xf32>
    %223 = arith.truncf %222 : vector<16x128xf32> to vector<16x128xbf16>
    %cst_98 = arith.constant dense<0.000000e+00> : vector<16x128xf32>
    %224 = tpu.matmul %223, %1, %cst_98 {dimension_numbers = #tpu.dot_dimension_numbers<[1], [0], [0], [1], [0, 0, 1, 1], [], []>} : vector<16x128xbf16>, vector<128x128xbf16>, vector<16x128xf32> -> vector<16x128xf32>
    %225 = arith.truncf %224 : vector<16x128xf32> to vector<16x128xbf16>
    %cst_99 = arith.constant dense<0.000000e+00> : vector<128x128xf32>
    %226 = tpu.matmul %207, %225, %cst_99 {dimension_numbers = #tpu.dot_dimension_numbers<[1], [0], [0], [1], [0, 0, 1, 1], [], []>} : vector<128x16xbf16>, vector<16x128xbf16>, vector<128x128xf32> -> vector<128x128xf32>
    %227 = vector.broadcast %211 : vector<128x1xf32> to vector<128x128xf32>
    %228 = arith.mulf %226, %227 : vector<128x128xf32>
    %229 = arith.truncf %228 : vector<128x128xf32> to vector<128x128xbf16>
    %cst_100 = arith.constant dense<0.000000e+00> : vector<16x128xf32>
    %230 = tpu.matmul %205, %229, %cst_100 {dimension_numbers = #tpu.dot_dimension_numbers<[1], [0], [0], [1], [0, 0, 1, 1], [], []>} : vector<16x128xbf16>, vector<128x128xbf16>, vector<16x128xf32> -> vector<16x128xf32>
    %231 = vector.broadcast %209 : vector<16x1xf32> to vector<16x128xf32>
    %232 = arith.mulf %230, %231 : vector<16x128xf32>
    %233 = vector.broadcast %5 : vector<1x128xf32> to vector<16x128xf32>
    %234 = arith.addf %232, %233 : vector<16x128xf32>
    %cst_101 = arith.constant 0.000000e+00 : f32
    %235 = vector.broadcast %cst_101 : f32 to vector<16x128xf32>
    %236 = arith.maximumf %234, %235 : vector<16x128xf32>
    %237 = arith.truncf %236 : vector<16x128xf32> to vector<16x128xbf16>
    %cst_102 = arith.constant dense<0.000000e+00> : vector<16x128xf32>
    %238 = tpu.matmul %237, %2, %cst_102 {dimension_numbers = #tpu.dot_dimension_numbers<[1], [0], [0], [1], [0, 0, 1, 1], [], []>} : vector<16x128xbf16>, vector<128x128xbf16>, vector<16x128xf32> -> vector<16x128xf32>
    %239 = arith.truncf %203 : vector<16x16xf32> to vector<16x16xbf16>
    %cst_103 = arith.constant dense<0.000000e+00> : vector<16x128xf32>
    %240 = tpu.matmul %239, %3, %cst_103 {dimension_numbers = #tpu.dot_dimension_numbers<[1], [0], [0], [1], [0, 0, 1, 1], [], []>} : vector<16x16xbf16>, vector<16x128xbf16>, vector<16x128xf32> -> vector<16x128xf32>
    %241 = arith.addf %238, %240 : vector<16x128xf32>
    %242 = vector.broadcast %6 : vector<1x128xf32> to vector<16x128xf32>
    %243 = arith.addf %241, %242 : vector<16x128xf32>
    %244 = vector.extract_strided_slice %243 {offsets = [0, 0], sizes = [16, 16], strides = [1, 1]} : vector<16x128xf32> to vector<16x16xf32>
    %245 = arith.negf %244 : vector<16x16xf32>
    %246 = math.exp %245 : vector<16x16xf32>
    %cst_104 = arith.constant 1.000000e+00 : f32
    %247 = vector.broadcast %cst_104 : f32 to vector<16x16xf32>
    %248 = arith.addf %247, %246 : vector<16x16xf32>
    %249 = arith.divf %247, %248 : vector<16x16xf32>
    %250 = vector.extract_strided_slice %243 {offsets = [0, 16], sizes = [16, 16], strides = [1, 1]} : vector<16x128xf32> to vector<16x16xf32>
    %251 = arith.negf %250 : vector<16x16xf32>
    %252 = math.exp %251 : vector<16x16xf32>
    %cst_105 = arith.constant 1.000000e+00 : f32
    %253 = vector.broadcast %cst_105 : f32 to vector<16x16xf32>
    %254 = arith.addf %253, %252 : vector<16x16xf32>
    %255 = arith.divf %253, %254 : vector<16x16xf32>
    %256 = vector.extract_strided_slice %243 {offsets = [0, 32], sizes = [16, 16], strides = [1, 1]} : vector<16x128xf32> to vector<16x16xf32>
    %257 = math.tanh %256 : vector<16x16xf32>
    %258 = vector.extract_strided_slice %243 {offsets = [0, 48], sizes = [16, 16], strides = [1, 1]} : vector<16x128xf32> to vector<16x16xf32>
    %259 = arith.negf %258 : vector<16x16xf32>
    %260 = math.exp %259 : vector<16x16xf32>
    %cst_106 = arith.constant 1.000000e+00 : f32
    %261 = vector.broadcast %cst_106 : f32 to vector<16x16xf32>
    %262 = arith.addf %261, %260 : vector<16x16xf32>
    %263 = arith.divf %261, %262 : vector<16x16xf32>
    %264 = arith.mulf %255, %201 : vector<16x16xf32>
    %265 = arith.mulf %249, %257 : vector<16x16xf32>
    %266 = arith.addf %264, %265 : vector<16x16xf32>
    %267 = math.tanh %266 : vector<16x16xf32>
    %268 = arith.mulf %263, %267 : vector<16x16xf32>
    %cst_107 = arith.constant 0.000000e+00 : f32
    %269 = vector.broadcast %cst_107 : f32 to vector<16x16xf32>
    %270 = arith.maximumf %268, %269 : vector<16x16xf32>
    %271 = arith.truncf %270 : vector<16x16xf32> to vector<16x16xbf16>
    %c0_108 = arith.constant 0 : index
    %c0_109 = arith.constant 0 : index
    %272 = vector.load %arg11[%c0_108, %c0_109] : memref<16x128xbf16, #tpu.memory_space<vmem>>, vector<16x128xbf16>
    %cst_110 = arith.constant dense<0.000000e+00> : vector<16x128xf32>
    %273 = tpu.matmul %271, %272, %cst_110 {dimension_numbers = #tpu.dot_dimension_numbers<[1], [0], [0], [1], [0, 0, 1, 1], [], []>} : vector<16x16xbf16>, vector<16x128xbf16>, vector<16x128xf32> -> vector<16x128xf32>
    %c0_111 = arith.constant 0 : index
    %c0_112 = arith.constant 0 : index
    %274 = vector.load %arg12[%c0_111, %c0_112] : memref<1x128xf32, #tpu.memory_space<vmem>>, vector<1x128xf32>
    %275 = vector.broadcast %274 : vector<1x128xf32> to vector<16x128xf32>
    %276 = arith.addf %273, %275 : vector<16x128xf32>
    %c0_113 = arith.constant 0 : index
    %c0_114 = arith.constant 0 : index
    %277 = vector.load %arg13[%c0_113, %c0_114] : memref<16x128xf32, #tpu.memory_space<vmem>>, vector<16x128xf32>
    tpu.vector_store %arg13[%c0_113, %c0_114], %276 {strides = array<i32>} : memref<16x128xf32, #tpu.memory_space<vmem>>, vector<16x128xf32>,
    return
  }
}

</mosaic_0001>

<bundles_post_ra>
// kernel: tpu_custom_call.1
= control target key start
LH: loop header
LB: loop body
LE: loop exit
PB: predicated region body
PF: predicated region fallthrough
CT: control target
= control target key end

     0   :  { %vm167_vm0 = vcmask 130048   ;;  %v4300_v3 = vmov 0   ;;  %s5816_s0 = inlined_call_operand.vmem [shape: bf16[4,16,128], index: 0, kind: input, shape index: {}]   ;;  %s5817_s1 = inlined_call_operand.vmem [shape: bf16[4,128,16], index: 1, kind: input, shape index: {}]   ;;  %s5818_s2 = inlined_call_operand.vmem [shape: f32[4,16,1], index: 2, kind: input, shape index: {}]   ;;  %s5819_s3 = inlined_call_operand.vmem [shape: f32[4,128,1], index: 3, kind: input, shape index: {}]   ;;  %s5820_s4 = inlined_call_operand.vmem [shape: bf16[16,128], index: 4, kind: input, shape index: {}]   ;;  %s5821_s5 = inlined_call_operand.vmem [shape: f32[1,128], index: 5, kind: input, shape index: {}]   ;;  %s5822_s6 = inlined_call_operand.vmem [shape: bf16[128,128], index: 6, kind: input, shape index: {}]   ;;  %s5823_s7 = inlined_call_operand.vmem [shape: f32[1,128], index: 7, kind: input, shape index: {}]   ;;  %s5824_s8 = inlined_call_operand.vmem [shape: bf16[128,128], index: 8, kind: input, shape index: {}]   ;;  %s5825_s9 = inlined_call_operand.vmem [shape: bf16[16,128], index: 9, kind: input, shape index: {}]   ;;  %s5826_s10 = inlined_call_operand.vmem [shape: f32[1,128], index: 10, kind: input, shape index: {}]   ;;  %s5827_s11 = inlined_call_operand.vmem [shape: bf16[16,128], index: 11, kind: input, shape index: {}]   ;;  %s5828_s12 = inlined_call_operand.vmem [shape: f32[1,128], index: 12, kind: input, shape index: {}]   ;;  %s5829_s13 = inlined_call_operand.hbm [shape: f32[16,128], index: 13, kind: output, shape index: {}]  }
   0x1   :  { %v4383_v0 = vld [vmem:[%s5820_s4] sm:$0xff]   ;;  %v4394_v2 = vld [vmem:[%s5817_s1 + $0x8] sm:$0xff]   ;;  %4136 = vset.pattern.permute.xlu0 %v4300_v3  ;;  %v4403_v4 = vld [vmem:[%s5817_s1 + $0x10] sm:$0xff]   ;;  %4137 = vset.pattern.permute.xlu1 %v4300_v3 }
   0x2   :  { %v4388_v1 = vld [vmem:[%s5817_s1] sm:$0xff]   ;;  %3632 = vmatprep.subr.bf16.mxu0 %v4383_v0  ;;  %v119_v5 = vld [vmem:[%s5819_s3 + $0x70] sm:$0xff]  ;;  %v4419_v7 = vld [vmem:[%s5817_s1 + $0x18] sm:$0xff]  }
   0x3   :  { %3633 = vmatpush3.bf16.msra.mxu0 %v4383_v0  ;;  %3634 = vmatprep.mubr.msk.bf16.mxu0 %vm167_vm0, %v4388_v1  ;;  %v117_v6 = vld [vmem:[%s5819_s3 + $0x60] sm:$0xff]  ;;  %v120_v9 = vld [vmem:[%s5819_s3 + $0x78] sm:$0xff]  ;;  %v118_v10 = vld [vmem:[%s5819_s3 + $0x68] sm:$0xff] }
   0x4   :  { %361 = vperm.xlu0 %4136, %v119_v5   ;;  %351 = vperm.xlu1 %4137, %v117_v6   ;;  %v4424_v8 = vld [vmem:[%s5817_s1 + $0x20] sm:$0xff]   ;;  %v115_v11 = vld [vmem:[%s5819_s3 + $0x50] sm:$0xff]  ;;  %v116_v12 = vld [vmem:[%s5819_s3 + $0x58] sm:$0xff] }
   0x5   :  { %v4445_v13 = vld [vmem:[%s5817_s1 + $0x28] sm:$0xff]   ;;  %v4450_v14 = vld [vmem:[%s5817_s1 + $0x30] sm:$0xff]   ;;  %v113_v15 = vld [vmem:[%s5819_s3 + $0x40] sm:$0xff] }
   0x6   :  { %3635 = vmatmul.mubr.msk.bf16.vlgmr.msra.gmra.mxu0 %vm167_vm0, %v4394_v2  ;;  %v114_v16 = vld [vmem:[%s5819_s3 + $0x48] sm:$0xff]  ;;  %v111_v17 = vld [vmem:[%s5819_s3 + $0x30] sm:$0xff]  ;;  %v112_v18 = vld [vmem:[%s5819_s3 + $0x38] sm:$0xff] }
   0x7   :  { %3638 = vmatprep.mubr.msk.bf16.mxu0 %vm167_vm0, %v4403_v4  ;;  %v4471_v19 = vld [vmem:[%s5817_s1 + $0x38] sm:$0xff]   ;;  %v109_v20 = vld [vmem:[%s5819_s3 + $0x20] sm:$0xff]  ;;  %v110_v21 = vld [vmem:[%s5819_s3 + $0x28] sm:$0xff] }
   0x8   :  { %366 = vperm.xlu0 %4136, %v120_v9   ;;  %356 = vperm.xlu1 %4137, %v118_v10   ;;  %v107_v22 = vld [vmem:[%s5819_s3 + $0x10] sm:$0xff]  ;;  %v108_v23 = vld [vmem:[%s5819_s3 + $0x18] sm:$0xff]  ;;  %v105_v24 = vld [vmem:[%s5819_s3] sm:$0xff] }
   0x9   :  { %v106_v25 = vld [vmem:[%s5819_s3 + $0x8] sm:$0xff]  ;;  %v103_v26 = vld [vmem:[%s5818_s2] sm:$0xff]  ;;  %v3245_v28 = vld [vmem:[%s5819_s3 + $0xf0] sm:$0xff] }
   0xa   :  { %v104_v27 = vld [vmem:[%s5818_s2 + $0x8] sm:$0xff]  ;;  %v3246_v29 = vld [vmem:[%s5819_s3 + $0xf8] sm:$0xff]  ;;  %v3243_v30 = vld [vmem:[%s5819_s3 + $0xe0] sm:$0xff] }
   0xb   :  { %v3244_v31 = vld [vmem:[%s5819_s3 + $0xe8] sm:$0xff]  ;;  %v3241_v32 = vld [vmem:[%s5819_s3 + $0xd0] sm:$0xff] }
   0xc   :  { %341 = vperm.xlu0 %4136, %v115_v11   ;;  %346 = vperm.xlu1 %4137, %v116_v12  }
   0xe   :  { %3639 = vmatmul.mubr.msk.bf16.gmra.mxu0 %vm167_vm0, %v4419_v7 }
   0xf   :  { %3642 = vmatprep.mubr.msk.bf16.mxu0 %vm167_vm0, %v4424_v8 }
  0x10   :  { %331 = vperm.xlu0 %4136, %v113_v15   ;;  %336 = vperm.xlu1 %4137, %v114_v16  }
  0x14   :  { %321 = vperm.xlu0 %4136, %v111_v17   ;;  %326 = vperm.xlu1 %4137, %v112_v18  }
  0x16   :  { %3643 = vmatmul.mubr.msk.bf16.gmra.mxu0 %vm167_vm0, %v4445_v13 }
  0x17   :  { %3646 = vmatprep.mubr.msk.bf16.mxu0 %vm167_vm0, %v4450_v14 }
  0x18   :  { %311 = vperm.xlu0 %4136, %v109_v20   ;;  %316 = vperm.xlu1 %4137, %v110_v21  }
  0x1c   :  { %301 = vperm.xlu0 %4136, %v107_v22   ;;  %306 = vperm.xlu1 %4137, %v108_v23  }
  0x1e   :  { %3647 = vmatmul.mubr.msk.bf16.gmra.mxu0 %vm167_vm0, %v4471_v19 }
  0x20   :  { %291 = vperm.xlu0 %4136, %v105_v24   ;;  %296 = vperm.xlu1 %4137, %v106_v25  }
  0x24   :  { %442 = vperm.xlu0 %4136, %v103_v26   ;;  %447 = vperm.xlu1 %4137, %v104_v27  }
  0x28   :  { %1196 = vperm.xlu0 %4136, %v3245_v28   ;;  %1201 = vperm.xlu1 %4137, %v3246_v29  }
  0x2c   :  { %1186 = vperm.xlu0 %4136, %v3243_v30   ;;  %1191 = vperm.xlu1 %4137, %v3244_v31  }
  0x2d   :  { %18 = vsyncpa [#allocation3], 0  ;;  %v3242_v33 = vld [vmem:[%s5819_s3 + $0xd8] sm:$0xff]  ;;  %v3239_v34 = vld [vmem:[%s5819_s3 + $0xc0] sm:$0xff]  ;;  %v5830_v46 = vmov 0.0   ;;  %vm4302_vm1 = vmmov 0  }
  0x2e   :  { %v3240_v35 = vld [vmem:[%s5819_s3 + $0xc8] sm:$0xff]  ;;  %v3237_v36 = vld [vmem:[%s5819_s3 + $0xb0] sm:$0xff]  ;;  %v3238_v37 = vld [vmem:[%s5819_s3 + $0xb8] sm:$0xff]  ;;  %3650 = vmatprep.subr.bf16.mxu1 %v5830_v46  ;;  %3670 = vmatprep.subr.bf16.mxu0 %v5830_v46  ;;  %s4303_s22 = smov 96   ;;  %s4304_s23 = smov 16  }
  0x2f   :  { %v3235_v38 = vld [vmem:[%s5819_s3 + $0xa0] sm:$0xff]  ;;  %v3236_v39 = vld [vmem:[%s5819_s3 + $0xa8] sm:$0xff]  ;;  %v3233_v40 = vld [vmem:[%s5819_s3 + $0x90] sm:$0xff]  ;;  %3666 = vmatprep.mubr.msk.bf16.mxu1 %vm4302_vm1, %v5830_v46  ;;  %3686 = vmatprep.mubr.msk.bf16.mxu0 %vm4302_vm1, %v5830_v46  ;;  %s4305_s24 = smov 32   ;;  %s4306_s29 = smov 80  }
  0x30   :  { %1176 = vperm.xlu0 %4136, %v3241_v32   ;;  %1181 = vperm.xlu1 %4137, %v3242_v33   ;;  %v3234_v41 = vld [vmem:[%s5819_s3 + $0x98] sm:$0xff]  ;;  %v3231_v42 = vld [vmem:[%s5819_s3 + $0x80] sm:$0xff]  ;;  %v3232_v43 = vld [vmem:[%s5819_s3 + $0x88] sm:$0xff] }
  0x31   :  { %v3229_v44 = vld [vmem:[%s5818_s2 + $0x10] sm:$0xff]  ;;  %v3230_v45 = vld [vmem:[%s5818_s2 + $0x18] sm:$0xff]  ;;  %v4575_v49 = vld [vmem:[%s5822_s6 + $0x28] sm:$0xff]  }
  0x32   :  { %v4562_v47 = vld [vmem:[%s5822_s6 + $0x38] sm:$0xff]   ;;  %v4568_v48 = vld [vmem:[%s5822_s6 + $0x30] sm:$0xff]   ;;  %v4582_v50 = vld [vmem:[%s5822_s6 + $0x20] sm:$0xff]  }
  0x33   :  { %3671 = vmatpush3.bf16.msra.mxu0 %v4562_v47  ;;  %v4589_v51 = vld [vmem:[%s5822_s6 + $0x18] sm:$0xff]  }
  0x34   :  { %1166 = vperm.xlu0 %4136, %v3239_v34   ;;  %1171 = vperm.xlu1 %4137, %v3240_v35  }
  0x35   :  { %3672 = vmatprep.subr.bf16.mxu0 %v5830_v46 }
  0x37   :  { %3673 = vmatpush3.bf16.msra.mxu0 %v4568_v48 }
  0x38   :  { %1156 = vperm.xlu0 %4136, %v3237_v36   ;;  %1161 = vperm.xlu1 %4137, %v3238_v37  }
  0x39   :  { %3674 = vmatprep.subr.bf16.mxu0 %v5830_v46 }
  0x3b   :  { %3675 = vmatpush3.bf16.msra.mxu0 %v4575_v49 }
  0x3c   :  { %1146 = vperm.xlu0 %4136, %v3235_v38   ;;  %1151 = vperm.xlu1 %4137, %v3236_v39  }
  0x3d   :  { %3676 = vmatprep.subr.bf16.mxu0 %v5830_v46 }
  0x3f   :  { %3677 = vmatpush3.bf16.msra.mxu0 %v4582_v50 }
  0x40   :  { %1136 = vperm.xlu0 %4136, %v3233_v40   ;;  %1141 = vperm.xlu1 %4137, %v3234_v41  }
  0x41   :  { %3678 = vmatprep.subr.bf16.mxu0 %v5830_v46 }
  0x43   :  { %3679 = vmatpush3.bf16.msra.mxu0 %v4589_v51 }
  0x44   :  { %1126 = vperm.xlu0 %4136, %v3231_v42   ;;  %1131 = vperm.xlu1 %4137, %v3232_v43  }
  0x45   :  { %3680 = vmatprep.subr.bf16.mxu0 %v5830_v46 }
  0x48   :  { %1277 = vperm.xlu0 %4136, %v3229_v44   ;;  %1282 = vperm.xlu1 %4137, %v3230_v45  }
  0x7f   :  { %v4596_v58 = vpop.permute.xlu1 %351  ;;  %v4598_v60 = vpop.permute.xlu0 %361 }
  0x83   :  { %v4600_v63 = vpop.permute.xlu1 %356  ;;  %v4602_v6 = vpop.permute.xlu0 %366 }
  0x87   :  { %v4604_v11 = vpop.permute.xlu1 %346  ;;  %v4606_v15 = vpop.permute.xlu0 %341 }
  0x8b   :  { %v4610_v21 = vpop.permute.xlu1 %336  ;;  %v4613_v25 = vpop.permute.xlu0 %331 }
  0x8f   :  { %v4618_v29 = vpop.permute.xlu1 %326  ;;  %v4621_v31 = vpop.permute.xlu0 %321 }
  0x93   :  { %v4626_v35 = vpop.permute.xlu1 %316  ;;  %v4630_v38 = vpop.permute.xlu0 %311 }
  0x97   :  { %v4635_v42 = vpop.permute.xlu1 %306  ;;  %v4638_v44 = vpop.permute.xlu0 %301 }
  0xc6   :  { %v3636_v52 = vpop.f32.mrf.mxu0 }
  0xc8   :  { %v4594_v53 = vpop.f32.mrf.mxu0 }
  0xca   :  { %v3637_v54 = vpop.f32.mrf.mxu0 }
  0xcb   :  { %v372_v45 = vmul.f32 %v3637_v54, %v4635_v42 }
  0xcc   :  { %v229_v55 = vpop.f32.mrf.mxu0 }
  0xce   :  { %v3640_v56 = vpop.f32.mrf.mxu0 }
  0xcf   :  { %v375_v39 = vmul.f32 %v3640_v56, %v4621_v31  ;;  %v371_v56 = vmul.f32 %v3636_v52, %v4638_v44  ;;  %v4655_v52 = vld [vmem:[%s5816_s0] sm:$0xff]  }
  0xd0   :  { %v242_v57 = vpop.f32.mrf.mxu0 }
  0xd1   :  { %v373_v43 = vmul.f32 %v4630_v38, %v242_v57 }
  0xd2   :  { %v3641_v59 = vpop.f32.mrf.mxu0 }
  0xd3   :  { %v376_v36 = vmul.f32 %v3641_v59, %v4618_v29 }
  0xd4   :  { %v245_v61 = vpop.f32.mrf.mxu0 }
  0xd5   :  { %v388_v40 = vpack.c.bf16 %v376_v36, %v375_v39  ;;  %v374_v41 = vmul.f32 %v4626_v35, %v245_v61  ;;  %v386_v61 = vpack.c.bf16 %v372_v45, %v371_v56 }
  0xd6   :  { %v3644_v62 = vpop.f32.mrf.mxu0 }
  0xd7   :  { %v379_v30 = vmul.f32 %v3644_v62, %v4606_v15  ;;  %v387_v59 = vpack.c.bf16 %v374_v41, %v373_v43  ;;  %v4643_v62 = vpop.permute.xlu1 %296 }
  0xd8   :  { %v258_v5 = vpop.f32.mrf.mxu0 }
  0xd9   :  { %v377_v34 = vmul.f32 %v4613_v25, %v258_v5  ;;  %v370_v5 = vmul.f32 %v4643_v62, %v229_v55  ;;  %v4663_v55 = vld [vmem:[%s5822_s6 + $0x10] sm:$0xff]  }
  0xda   :  { %v3645_v9 = vpop.f32.mrf.mxu0  ;;  %3681 = vmatpush3.bf16.msra.mxu0 %v4663_v55 }
  0xdb   :  { %v380_v27 = vmul.f32 %v3645_v9, %v4604_v11  ;;  %v4647_v9 = vpop.permute.xlu0 %291  ;;  %3682 = vmatprep.subr.bf16.mxu0 %v5830_v46 }
  0xdc   :  { %v261_v10 = vpop.f32.mrf.mxu0  ;;  %v369_v57 = vmul.f32 %v4647_v9, %v4594_v53  ;;  %v4670_v53 = vld [vmem:[%s5822_s6 + $0x8] sm:$0xff]  }
  0xdd   :  { %v390_v32 = vpack.c.bf16 %v380_v27, %v379_v30  ;;  %v378_v33 = vmul.f32 %v4610_v21, %v261_v10 }
  0xde   :  { %v3648_v12 = vpop.f32.mrf.mxu0  ;;  %v385_v54 = vpack.c.bf16 %v370_v5, %v369_v57  ;;  %3683 = vmatpush3.bf16.msra.mxu0 %v4670_v53 }
  0xdf   :  { %v383_v18 = vmul.f32 %v3648_v12, %v4598_v60  ;;  %v389_v37 = vpack.c.bf16 %v378_v33, %v377_v34  ;;  %3684 = vmatprep.subr.bf16.mxu0 %v5830_v46  ;;  %v4681_v10 = vpop.permute.xlu0 %442 }
  0xe0   :  { %v274_v16 = vpop.f32.mrf.mxu0 }
  0xe1   :  { %v381_v26 = vmul.f32 %v4596_v58, %v274_v16 }
  0xe2   :  { %v3649_v17 = vpop.f32.mrf.mxu0 }
  0xe3   :  { %v384_v20 = vmul.f32 %v3649_v17, %v4602_v6  ;;  %v4687_v17 = vld [vmem:[%s5821_s5] ss:$0 sm:$0xff] }
  0xe4   :  { %v277_v22 = vpop.f32.mrf.mxu0 }
  0xe5   :  { %v382_v23 = vmul.f32 %v4600_v63, %v277_v22  ;;  %v392_v24 = vpack.c.bf16 %v384_v20, %v383_v18  ;;  %v4689_v20 = vpop.permute.xlu1 %447 }
  0xe7   :  { %3651 = vmatpush3.bf16.msra.mxu1 %v392_v24  ;;  %v391_v28 = vpack.c.bf16 %v382_v23, %v381_v26 }
  0xe8   :  { %3652 = vmatprep.subr.bf16.mxu1 %v5830_v46 }
  0xeb   :  { %3653 = vmatpush3.bf16.msra.mxu1 %v391_v28 }
  0xec   :  { %3654 = vmatprep.subr.bf16.mxu1 %v5830_v46 }
  0xef   :  { %3655 = vmatpush3.bf16.msra.mxu1 %v390_v32 }
  0xf0   :  { %3656 = vmatprep.subr.bf16.mxu1 %v5830_v46 }
  0xf3   :  { %3657 = vmatpush3.bf16.msra.mxu1 %v389_v37 }
  0xf4   :  { %3658 = vmatprep.subr.bf16.mxu1 %v5830_v46 }
  0xf7   :  { %3659 = vmatpush3.bf16.msra.mxu1 %v388_v40 }
  0xf8   :  { %3660 = vmatprep.subr.bf16.mxu1 %v5830_v46 }
  0xfb   :  { %3661 = vmatpush3.bf16.msra.mxu1 %v387_v59 }
  0xfc   :  { %3662 = vmatprep.subr.bf16.mxu1 %v5830_v46 }
  0xff   :  { %3663 = vmatpush3.bf16.msra.mxu1 %v386_v61 }
 0x100   :  { %3664 = vmatprep.subr.bf16.mxu1 %v5830_v46 }
 0x103   :  { %3665 = vmatpush3.bf16.msra.mxu1 %v385_v54 }
 0x106   :  { %3667 = vmatmul.mubr.bf16.vlgmr.msra.gmra.mxu1 %v4655_v52 }
 0x107   :  { %3692 = vmatprep.mubr.msk.bf16.mxu1 %vm167_vm0, %v4388_v1  ;;  %v4677_v1 = vld [vmem:[%s5822_s6] sm:$0xff]  }
 0x108   :  { %3685 = vmatpush3.bf16.msra.mxu0 %v4677_v1 }
 0x109   :  { %3734 = vmatprep.subr.bf16.mxu0 %v5830_v46 }
 0x1c6   :  { %v433_v12 = vpop.f32.mrf.mxu1 }
 0x1c7   :  { %v450_v16 = vmul.f32 %v4681_v10, %v433_v12 }
 0x1c8   :  { %v3668_v18 = vpop.f32.mrf.mxu1 }
 0x1c9   :  { %v458_v23 = vadd.f32 %v4687_v17, %v450_v16 }
 0x1ca   :  { %v436_v22 = vpop.f32.mrf.mxu1 }
 0x1cb   :  { %v451_v24 = vmul.f32 %v4689_v20, %v436_v22  ;;  %v460_v28 = vmax.f32 %v458_v23, 0.0 }
 0x1cc   :  { %v3669_v26 = vpop.f32.mrf.mxu1 }
 0x1cd   :  { %v459_v27 = vadd.f32 %v4687_v17, %v451_v24 }
 0x1cf   :  { %v461_v30 = vmax.f32 %v459_v27, 0.0 }
 0x1d1   :  { %v462_v32 = vpack.c.bf16 %v461_v30, %v460_v28 }
 0x1d3   :  { %3687 = vmatmul.mubr.bf16.vlgmr.msra.gmra.mxu0 %v462_v32 }
 0x1d4   :  { %3750 = vmatprep.mubr.msk.bf16.mxu0 %vm4302_vm1, %v5830_v46 }
 0x293   :  { %v545_v33 = vpop.f32.mrf.mxu0 }
 0x295   :  { %v3688_v34 = vpop.f32.mrf.mxu0 }
 0x297   :  { %v548_v36 = vpop.f32.mrf.mxu0 }
 0x298   :  { %v552_v37 = vpack.c.bf16 %v548_v36, %v545_v33 }
 0x299   :  { %v3689_v39 = vpop.f32.mrf.mxu0 }
 0x29a   :  { %3690 = vmatprep.subr.bf16.mxu1 %v552_v37 }
 0x29b   :  { %3691 = vmatpush3.bf16.msra.mxu1 %v552_v37 }
 0x29c   :  { %3708 = vmatprep.subr.bf16.mxu1 %v5830_v46 }
 0x29e   :  { %3693 = vmatmul.mubr.msk.bf16.vlgmr.msra.gmra.mxu1 %vm167_vm0, %v4394_v2  ;;  %v4716_v2 = vld [vmem:[%s5824_s8 + $0x38] sm:$0xff]  }
 0x29f   :  { %3696 = vmatprep.mubr.msk.bf16.mxu1 %vm167_vm0, %v4403_v4  ;;  %3735 = vmatpush3.bf16.msra.mxu0 %v4716_v2  ;;  %v4722_v4 = vld [vmem:[%s5824_s8 + $0x30] sm:$0xff]  }
 0x2a0   :  { %3736 = vmatprep.subr.bf16.mxu0 %v5830_v46 }
 0x2a3   :  { %3737 = vmatpush3.bf16.msra.mxu0 %v4722_v4 }
 0x2a4   :  { %3738 = vmatprep.subr.bf16.mxu0 %v5830_v46 }
 0x2a6   :  { %3697 = vmatmul.mubr.msk.bf16.gmra.mxu1 %vm167_vm0, %v4419_v7  ;;  %v4729_v7 = vld [vmem:[%s5824_s8 + $0x28] sm:$0xff]  }
 0x2a7   :  { %3700 = vmatprep.mubr.msk.bf16.mxu1 %vm167_vm0, %v4424_v8  ;;  %3739 = vmatpush3.bf16.msra.mxu0 %v4729_v7  ;;  %v4736_v8 = vld [vmem:[%s5824_s8 + $0x20] sm:$0xff]  }
 0x2a8   :  { %3740 = vmatprep.subr.bf16.mxu0 %v5830_v46 }
 0x2ab   :  { %3741 = vmatpush3.bf16.msra.mxu0 %v4736_v8 }
 0x2ac   :  { %3742 = vmatprep.subr.bf16.mxu0 %v5830_v46 }
 0x2ae   :  { %3701 = vmatmul.mubr.msk.bf16.gmra.mxu1 %vm167_vm0, %v4445_v13  ;;  %v4743_v13 = vld [vmem:[%s5824_s8 + $0x18] sm:$0xff]  }
 0x2af   :  { %3704 = vmatprep.mubr.msk.bf16.mxu1 %vm167_vm0, %v4450_v14  ;;  %3743 = vmatpush3.bf16.msra.mxu0 %v4743_v13 }
 0x2b0   :  { %3744 = vmatprep.subr.bf16.mxu0 %v5830_v46 }
 0x2b6   :  { %3705 = vmatmul.mubr.msk.bf16.gmra.mxu1 %vm167_vm0, %v4471_v19 }
 0x2b7   :  { %3724 = vmatprep.mubr.msk.bf16.mxu1 %vm4302_vm1, %v5830_v46 }
 0x35e   :  { %v3694_v14 = vpop.f32.mrf.mxu1 }
 0x35f   :  { %v652_v39 = vmul.f32 %v3694_v14, %v4638_v44  ;;  %v4795_v44 = vld [vmem:[%s5817_s1 + $0x48] sm:$0xff]   ;;  %v4837_v14 = vld [vmem:[%s5817_s1 + $0x78] sm:$0xff]  }
 0x360   :  { %v587_v19 = vpop.f32.mrf.mxu1 }
 0x362   :  { %v3695_v40 = vpop.f32.mrf.mxu1 }
 0x364   :  { %v590_v41 = vpop.f32.mrf.mxu1 }
 0x366   :  { %v3698_v43 = vpop.f32.mrf.mxu1 }
 0x367   :  { %v656_v36 = vmul.f32 %v3698_v43, %v4621_v31  ;;  %v651_v31 = vmul.f32 %v590_v41, %v4643_v62  ;;  %v650_v43 = vmul.f32 %v587_v19, %v4647_v9  ;;  %v4800_v62 = vld [vmem:[%s5817_s1 + $0x50] sm:$0xff]   ;;  %v4823_v9 = vld [vmem:[%s5817_s1 + $0x68] sm:$0xff]   ;;  %v4860_v41 = vld [vmem:[%s5824_s8] sm:$0xff]  }
 0x368   :  { %v603_v45 = vpop.f32.mrf.mxu1  ;;  %v4846_v19 = vld [vmem:[%s5824_s8 + $0x10] sm:$0xff]  }
 0x369   :  { %v654_v37 = vmul.f32 %v603_v45, %v4630_v38  ;;  %v4774_v38 = vld [vmem:[%s5825_s9] sm:$0xff]   ;;  %3745 = vmatpush3.bf16.msra.mxu0 %v4846_v19 }
 0x36a   :  { %v3699_v59 = vpop.f32.mrf.mxu1  ;;  %3746 = vmatprep.subr.bf16.mxu0 %v5830_v46 }
 0x36c   :  { %v606_v56 = vpop.f32.mrf.mxu1 }
 0x36e   :  { %v3702_v61 = vpop.f32.mrf.mxu1 }
 0x36f   :  { %v660_v33 = vmul.f32 %v3702_v61, %v4606_v15  ;;  %v655_v15 = vmul.f32 %v606_v56, %v4626_v35  ;;  %v666_v35 = vpack.c.bf16 %v651_v31, %v650_v43  ;;  %v4868_v56 = vld [vmem:[%s5823_s7] ss:$0 sm:$0xff] }
 0x370   :  { %v619_v5 = vpop.f32.mrf.mxu1 }
 0x371   :  { %v658_v34 = vmul.f32 %v619_v5, %v4613_v25  ;;  %v668_v25 = vpack.c.bf16 %v655_v15, %v654_v37 }
 0x372   :  { %v3703_v57 = vpop.f32.mrf.mxu1 }
 0x373   :  { %v661_v30 = vmul.f32 %v3703_v57, %v4604_v11 }
 0x374   :  { %v622_v54 = vpop.f32.mrf.mxu1 }
 0x376   :  { %v3706_v12 = vpop.f32.mrf.mxu1 }
 0x377   :  { %v664_v22 = vmul.f32 %v3706_v12, %v4598_v60  ;;  %v671_v60 = vpack.c.bf16 %v661_v30, %v660_v33 }
 0x378   :  { %v635_v16 = vpop.f32.mrf.mxu1 }
 0x379   :  { %v662_v28 = vmul.f32 %v635_v16, %v4596_v58  ;;  %v657_v58 = vmul.f32 %v3699_v59, %v4618_v29 }
 0x37a   :  { %v3707_v18 = vpop.f32.mrf.mxu1 }
 0x37b   :  { %v665_v23 = vmul.f32 %v3707_v18, %v4602_v6  ;;  %v659_v6 = vmul.f32 %v622_v54, %v4610_v21  ;;  %v669_v11 = vpack.c.bf16 %v657_v58, %v656_v36  ;;  %v653_v21 = vmul.f32 %v3695_v40, %v4635_v42  ;;  %v4785_v42 = vld [vmem:[%s5817_s1 + $0x40] sm:$0xff]   ;;  %v4853_v40 = vld [vmem:[%s5824_s8 + $0x8] sm:$0xff]  }
 0x37c   :  { %v638_v24 = vpop.f32.mrf.mxu1  ;;  %3747 = vmatpush3.bf16.msra.mxu0 %v4853_v40 }
 0x37d   :  { %v673_v26 = vpack.c.bf16 %v665_v23, %v664_v22  ;;  %v663_v27 = vmul.f32 %v638_v24, %v4600_v63  ;;  %v670_v63 = vpack.c.bf16 %v659_v6, %v658_v34  ;;  %v667_v29 = vpack.c.bf16 %v653_v21, %v652_v39  ;;  %3748 = vmatprep.subr.bf16.mxu0 %v5830_v46 }
 0x37f   :  { %3709 = vmatpush3.bf16.msra.mxu1 %v673_v26  ;;  %v672_v32 = vpack.c.bf16 %v663_v27, %v662_v28 }
 0x380   :  { %3710 = vmatprep.subr.bf16.mxu1 %v5830_v46  ;;  %3749 = vmatpush3.bf16.msra.mxu0 %v4860_v41 }
 0x381   :  { %3792 = vmatprep.subr.bf16.mxu0 %v5830_v46 }
 0x383   :  { %3711 = vmatpush3.bf16.msra.mxu1 %v672_v32 }
 0x384   :  { %3712 = vmatprep.subr.bf16.mxu1 %v5830_v46 }
 0x387   :  { %3713 = vmatpush3.bf16.msra.mxu1 %v671_v60  ;;  %v4895_v60 = vpop.permute.xlu1 %1201 }
 0x388   :  { %3714 = vmatprep.subr.bf16.mxu1 %v5830_v46 }
 0x38b   :  { %3715 = vmatpush3.bf16.msra.mxu1 %v670_v63 }
 0x38c   :  { %3716 = vmatprep.subr.bf16.mxu1 %v5830_v46 }
 0x38f   :  { %3717 = vmatpush3.bf16.msra.mxu1 %v669_v11 }
 0x390   :  { %3718 = vmatprep.subr.bf16.mxu1 %v5830_v46 }
 0x393   :  { %3719 = vmatpush3.bf16.msra.mxu1 %v668_v25 }
 0x394   :  { %3720 = vmatprep.subr.bf16.mxu1 %v5830_v46 }
 0x397   :  { %3721 = vmatpush3.bf16.msra.mxu1 %v667_v29 }
 0x398   :  { %3722 = vmatprep.subr.bf16.mxu1 %v5830_v46 }
 0x39b   :  { %3723 = vmatpush3.bf16.msra.mxu1 %v666_v35 }
 0x39c   :  { %3728 = vmatprep.subr.bf16.mxu1 %v5830_v46 }
 0x39e   :  { %3725 = vmatmul.mubr.bf16.vlgmr.msra.gmra.mxu1 %v4655_v52  ;;  %v4828_v52 = vld [vmem:[%s5817_s1 + $0x70] sm:$0xff]  }
 0x39f   :  { %3729 = vmatpush3.bf16.msra.mxu1 %v4774_v38  ;;  %3730 = vmatprep.mubr.msk.bf16.mxu1 %vm4302_vm1, %v5830_v46 }
 0x3a0   :  { %3754 = vmatprep.subr.bf16.mxu1 %v4383_v0 }
 0x3a6   :  { %3731 = vmatmul.mubr.bf16.vlgmr.msra.gmra.mxu1 %v4300_v3  ;;  %v4814_v3 = vld [vmem:[%s5817_s1 + $0x60] sm:$0xff]  }
 0x3a7   :  { %3755 = vmatpush3.bf16.msra.mxu1 %v4383_v0  ;;  %3756 = vmatprep.mubr.msk.bf16.mxu1 %vm167_vm0, %v4785_v42  ;;  %v4809_v0 = vld [vmem:[%s5817_s1 + $0x58] sm:$0xff]  }
 0x3a8   :  { %3772 = vmatprep.subr.bf16.mxu1 %v5830_v46 }
 0x3ae   :  { %3757 = vmatmul.mubr.msk.bf16.vlgmr.msra.gmra.mxu1 %vm167_vm0, %v4795_v44 }
 0x3af   :  { %3760 = vmatprep.mubr.msk.bf16.mxu1 %vm167_vm0, %v4800_v62 }
 0x3b6   :  { %3761 = vmatmul.mubr.msk.bf16.gmra.mxu1 %vm167_vm0, %v4809_v0 }
 0x3b7   :  { %3764 = vmatprep.mubr.msk.bf16.mxu1 %vm167_vm0, %v4814_v3 }
 0x3be   :  { %3765 = vmatmul.mubr.msk.bf16.gmra.mxu1 %vm167_vm0, %v4823_v9 }
 0x3bf   :  { %3768 = vmatprep.mubr.msk.bf16.mxu1 %vm167_vm0, %v4828_v52 }
 0x3c6   :  { %3769 = vmatmul.mubr.msk.bf16.gmra.mxu1 %vm167_vm0, %v4837_v14 }
 0x3c7   :  { %3788 = vmatprep.mubr.msk.bf16.mxu1 %vm4302_vm1, %v5830_v46 }
 0x45e   :  { %v708_v45 = vpop.f32.mrf.mxu1 }
 0x45f   :  { %v715_v59 = vmul.f32 %v708_v45, %v4681_v10 }
 0x460   :  { %v3726_v61 = vpop.f32.mrf.mxu1 }
 0x461   :  { %v723_v57 = vadd.f32 %v4868_v56, %v715_v59 }
 0x462   :  { %v711_v5 = vpop.f32.mrf.mxu1 }
 0x463   :  { %v716_v54 = vmul.f32 %v711_v5, %v4689_v20  ;;  %v725_v22 = vmax.f32 %v723_v57, 0.0 }
 0x464   :  { %v3727_v12 = vpop.f32.mrf.mxu1 }
 0x465   :  { %v724_v16 = vadd.f32 %v4868_v56, %v716_v54 }
 0x466   :  { %v4873_v18 = vpop.f32.mrf.mxu1 }
 0x467   :  { %v726_v23 = vmax.f32 %v724_v16, 0.0 }
 0x468   :  { %v3732_v24 = vpop.f32.mrf.mxu1 }
 0x469   :  { %v727_v10 = vpack.c.bf16 %v726_v23, %v725_v22 }
 0x46a   :  { %v4875_v26 = vpop.f32.mrf.mxu1 }
 0x46b   :  { %3751 = vmatmul.mubr.bf16.vlgmr.msra.gmra.mxu0 %v727_v10 }
 0x46c   :  { %v3733_v27 = vpop.f32.mrf.mxu1  ;;  %3793 = vmatpush3.bf16.msra.mxu0 %v4562_v47  ;;  %3808 = vmatprep.mubr.msk.bf16.mxu0 %vm4302_vm1, %v5830_v46 }
 0x46d   :  { %3794 = vmatprep.subr.bf16.mxu0 %v5830_v46 }
 0x46e   :  { %v4881_v20 = vpop.f32.mrf.mxu1 }
 0x470   :  { %v4883_v28 = vpop.f32.mrf.mxu1  ;;  %3795 = vmatpush3.bf16.msra.mxu0 %v4568_v48  ;;  %v4897_v48 = vpop.permute.xlu0 %1196 }
 0x471   :  { %3796 = vmatprep.subr.bf16.mxu0 %v5830_v46 }
 0x472   :  { %v4887_v30 = vpop.f32.mrf.mxu1 }
 0x474   :  { %v4889_v32 = vpop.f32.mrf.mxu1  ;;  %3797 = vmatpush3.bf16.msra.mxu0 %v4575_v49  ;;  %v4901_v49 = vpop.permute.xlu1 %1191 }
 0x475   :  { %3798 = vmatprep.subr.bf16.mxu0 %v5830_v46 }
 0x476   :  { %v3762_v47 = vpop.f32.mrf.mxu1 }
 0x478   :  { %v1077_v33 = vpop.f32.mrf.mxu1  ;;  %3799 = vmatpush3.bf16.msra.mxu0 %v4582_v50  ;;  %v4905_v50 = vpop.permute.xlu0 %1186 }
 0x479   :  { %3800 = vmatprep.subr.bf16.mxu0 %v5830_v46  ;;  %v4909_v15 = vpop.permute.xlu1 %1181 }
 0x47a   :  { %v3763_v6 = vpop.f32.mrf.mxu1 }
 0x47c   :  { %v1080_v34 = vpop.f32.mrf.mxu1  ;;  %3801 = vmatpush3.bf16.msra.mxu0 %v4589_v51  ;;  %v4911_v37 = vpop.permute.xlu0 %1176 }
 0x47d   :  { %3802 = vmatprep.subr.bf16.mxu0 %v5830_v46  ;;  %v4917_v29 = vpop.permute.xlu1 %1171 }
 0x47e   :  { %v3766_v58 = vpop.f32.mrf.mxu1 }
 0x47f   :  { %v1214_v5 = vmul.f32 %v3766_v58, %v4911_v37 }
 0x480   :  { %v1093_v63 = vpop.f32.mrf.mxu1  ;;  %3803 = vmatpush3.bf16.msra.mxu0 %v4663_v55  ;;  %v4920_v35 = vpop.permute.xlu0 %1166 }
 0x481   :  { %3804 = vmatprep.subr.bf16.mxu0 %v5830_v46  ;;  %v4925_v61 = vpop.permute.xlu1 %1161  ;;  %v1212_v16 = vmul.f32 %v4920_v35, %v1093_v63 }
 0x482   :  { %v3767_v36 = vpop.f32.mrf.mxu1  ;;  %v1211_v23 = vmul.f32 %v3763_v6, %v4925_v61 }
 0x484   :  { %v1096_v11 = vpop.f32.mrf.mxu1  ;;  %3805 = vmatpush3.bf16.msra.mxu0 %v4670_v53  ;;  %v4928_v57 = vpop.permute.xlu0 %1156 }
 0x485   :  { %3806 = vmatprep.subr.bf16.mxu0 %v5830_v46  ;;  %v1213_v12 = vmul.f32 %v4917_v29, %v1096_v11  ;;  %v4933_v22 = vpop.permute.xlu1 %1151  ;;  %v1210_v27 = vmul.f32 %v3762_v47, %v4928_v57 }
 0x486   :  { %v3770_v51 = vpop.f32.mrf.mxu1 }
 0x487   :  { %v1218_v25 = vmul.f32 %v3770_v51, %v4897_v48  ;;  %v1224_v24 = vpack.c.bf16 %v1213_v12, %v1212_v16  ;;  %v1223_v58 = vpack.c.bf16 %v1211_v23, %v1210_v27 }
 0x488   :  { %v1109_v21 = vpop.f32.mrf.mxu1  ;;  %3807 = vmatpush3.bf16.msra.mxu0 %v4677_v1  ;;  %v1215_v1 = vmul.f32 %v3767_v36, %v4909_v15  ;;  %v4937_v10 = vpop.permute.xlu0 %1146  ;;  %v1209_v36 = vmul.f32 %v4933_v22, %v1080_v34 }
 0x489   :  { %3856 = vmatprep.subr.bf16.mxu0 %v5830_v46  ;;  %v1216_v45 = vmul.f32 %v4905_v50, %v1109_v21  ;;  %v4942_v11 = vpop.permute.xlu1 %1141  ;;  %v1208_v63 = vmul.f32 %v4937_v10, %v1077_v33 }
 0x48a   :  { %v3771_v55 = vpop.f32.mrf.mxu1  ;;  %v1225_v54 = vpack.c.bf16 %v1215_v1, %v1214_v5  ;;  %v1207_v6 = vmul.f32 %v4887_v30, %v4942_v11 }
 0x48b   :  { %v1219_v39 = vmul.f32 %v3771_v55, %v4895_v60  ;;  %v1222_v21 = vpack.c.bf16 %v1209_v36, %v1208_v63 }
 0x48c   :  { %v1112_v53 = vpop.f32.mrf.mxu1  ;;  %v4945_v51 = vpop.permute.xlu0 %1136 }
 0x48d   :  { %v1227_v31 = vpack.c.bf16 %v1219_v39, %v1218_v25  ;;  %v1217_v43 = vmul.f32 %v4901_v49, %v1112_v53  ;;  %v1206_v47 = vmul.f32 %v4881_v20, %v4945_v51  ;;  %v4952_v55 = vpop.permute.xlu1 %1131  ;;  %v4965_v20 = vld [vmem:[%s5816_s0 + $0x8] sm:$0xff]  }
 0x48e   :  { %v1205_v33 = vmul.f32 %v4952_v55, %v4889_v32  ;;  %v4973_v32 = vld [vmem:[%s5826_s10] ss:$0 sm:$0xff] }
 0x48f   :  { %3773 = vmatpush3.bf16.msra.mxu1 %v1227_v31  ;;  %v1226_v59 = vpack.c.bf16 %v1217_v43, %v1216_v45  ;;  %v1221_v34 = vpack.c.bf16 %v1207_v6, %v1206_v47 }
 0x490   :  { %3774 = vmatprep.subr.bf16.mxu1 %v5830_v46  ;;  %v4957_v25 = vpop.permute.xlu0 %1126 }
 0x491   :  { %v1204_v39 = vmul.f32 %v4957_v25, %v4883_v28 }
 0x493   :  { %3775 = vmatpush3.bf16.msra.mxu1 %v1226_v59  ;;  %v1220_v30 = vpack.c.bf16 %v1205_v33, %v1204_v39 }
 0x494   :  { %3776 = vmatprep.subr.bf16.mxu1 %v5830_v46  ;;  %v4981_v12 = vpop.permute.xlu0 %1277 }
 0x497   :  { %3777 = vmatpush3.bf16.msra.mxu1 %v1225_v54 }
 0x498   :  { %3778 = vmatprep.subr.bf16.mxu1 %v5830_v46 }
 0x49b   :  { %3779 = vmatpush3.bf16.msra.mxu1 %v1224_v24  ;;  %v4984_v24 = vpop.permute.xlu1 %1282 }
 0x49c   :  { %3780 = vmatprep.subr.bf16.mxu1 %v5830_v46 }
 0x49f   :  { %3781 = vmatpush3.bf16.msra.mxu1 %v1223_v58 }
 0x4a0   :  { %3782 = vmatprep.subr.bf16.mxu1 %v5830_v46 }
 0x4a3   :  { %3783 = vmatpush3.bf16.msra.mxu1 %v1222_v21 }
 0x4a4   :  { %3784 = vmatprep.subr.bf16.mxu1 %v5830_v46 }
 0x4a7   :  { %3785 = vmatpush3.bf16.msra.mxu1 %v1221_v34 }
 0x4a8   :  { %3786 = vmatprep.subr.bf16.mxu1 %v5830_v46 }
 0x4ab   :  { %3787 = vmatpush3.bf16.msra.mxu1 %v1220_v30 }
 0x4ae   :  { %3789 = vmatmul.mubr.bf16.vlgmr.msra.gmra.mxu1 %v4965_v20 }
 0x4af   :  { %3814 = vmatprep.mubr.msk.bf16.mxu1 %vm167_vm0, %v4785_v42 }
 0x52b   :  { %v860_v28 = vpop.f32.mrf.mxu0 }
 0x52c   :  { %v861_v53 = vadd.f32 %v860_v28, %v4873_v18 }
 0x52d   :  { %v3752_v31 = vpop.f32.mrf.mxu0 }
 0x52e   :  { %v873_v43 = vadd.f32 %v4973_v32, %v861_v53 }
 0x52f   :  { %v863_v45 = vpop.f32.mrf.mxu0 }
 0x530   :  { %4193 = vtanh.f32 %v873_v43  ;;  %v864_v1 = vadd.f32 %v863_v45, %v4875_v26 }
 0x531   :  { %v3753_v59 = vpop.f32.mrf.mxu0 }
 0x532   :  { %v874_v5 = vadd.f32 %v4973_v32, %v864_v1 }
 0x534   :  { %4195 = vtanh.f32 %v874_v5 }
 0x53d   :  { %v4194_v42 = vpop.eup %4193 }
 0x53e   :  { %893 = vrot.lane.b32.xlu0 %v4194_v42, %s4303_s22  ;;  %v3309_v42 = vld [vmem:[%s5819_s3 + $0x170] sm:$0xff] }
 0x541   :  { %v4196_v54 = vpop.eup %4195 }
 0x542   :  { %895 = vrot.lane.b32.xlu1 %v4196_v54, %s4303_s22 }
 0x56e   :  { %v1268_v18 = vpop.f32.mrf.mxu1 }
 0x56f   :  { %v1285_v16 = vmul.f32 %v4981_v12, %v1268_v18 }
 0x570   :  { %v3790_v23 = vpop.f32.mrf.mxu1 }
 0x571   :  { %v1287_v27 = vadd.f32 %v4687_v17, %v1285_v16  ;;  %v3307_v16 = vld [vmem:[%s5819_s3 + $0x160] sm:$0xff] }
 0x572   :  { %v1271_v26 = vpop.f32.mrf.mxu1 }
 0x573   :  { %v1286_v58 = vmul.f32 %v4984_v24, %v1271_v26  ;;  %v1289_v6 = vmax.f32 %v1287_v27, 0.0  ;;  %v3305_v27 = vld [vmem:[%s5819_s3 + $0x150] sm:$0xff] }
 0x574   :  { %v3791_v36 = vpop.f32.mrf.mxu1 }
 0x575   :  { %v1288_v63 = vadd.f32 %v4687_v17, %v1286_v58  ;;  %v3209_v17 = vmul.f32 -1.442695, %v873_v43  ;;  %v3303_v58 = vld [vmem:[%s5819_s3 + $0x140] sm:$0xff]  ;;  %v3301_v36 = vld [vmem:[%s5819_s3 + $0x130] sm:$0xff] }
 0x577   :  { %v1290_v21 = vmax.f32 %v1288_v63, 0.0  ;;  %4197 = vpow2.f32 %v3209_v17  ;;  %v3306_v17 = vld [vmem:[%s5819_s3 + $0x158] sm:$0xff] }
 0x579   :  { %v1291_v47 = vpack.c.bf16 %v1290_v21, %v1289_v6 }
 0x57b   :  { %3809 = vmatmul.mubr.bf16.vlgmr.msra.gmra.mxu0 %v1291_v47 }
 0x57c   :  { %3857 = vmatpush3.bf16.msra.mxu0 %v4716_v2  ;;  %3872 = vmatprep.mubr.msk.bf16.mxu0 %vm4302_vm1, %v5830_v46  ;;  %v3210_v2 = vmul.f32 -1.442695, %v874_v5 }
 0x57d   :  { %3858 = vmatprep.subr.bf16.mxu0 %v5830_v46 }
 0x57e   :  { %4199 = vpow2.f32 %v3210_v2  ;;  %v3304_v2 = vld [vmem:[%s5819_s3 + $0x148] sm:$0xff] }
 0x580   :  { %3859 = vmatpush3.bf16.msra.mxu0 %v4722_v4 }
 0x581   :  { %3860 = vmatprep.subr.bf16.mxu0 %v5830_v46 }
 0x584   :  { %3861 = vmatpush3.bf16.msra.mxu0 %v4729_v7  ;;  %v4198_v4 = vpop.eup %4197 }
 0x585   :  { %3862 = vmatprep.subr.bf16.mxu0 %v5830_v46  ;;  %v881_v7 = vadd.f32 1.0, %v4198_v4  ;;  %v3302_v4 = vld [vmem:[%s5819_s3 + $0x138] sm:$0xff] }
 0x587   :  { %4201 = vrcp.f32 %v881_v7  ;;  %v3300_v7 = vld [vmem:[%s5819_s3 + $0x128] sm:$0xff] }
 0x588   :  { %3863 = vmatpush3.bf16.msra.mxu0 %v4736_v8 }
 0x589   :  { %3864 = vmatprep.subr.bf16.mxu0 %v5830_v46 }
 0x58b   :  { %v4200_v8 = vpop.eup %4199 }
 0x58c   :  { %3865 = vmatpush3.bf16.msra.mxu0 %v4743_v13  ;;  %v882_v13 = vadd.f32 1.0, %v4200_v8  ;;  %v3298_v8 = vld [vmem:[%s5819_s3 + $0x118] sm:$0xff] }
 0x58d   :  { %3866 = vmatprep.subr.bf16.mxu0 %v5830_v46 }
 0x58e   :  { %4203 = vrcp.f32 %v882_v13  ;;  %v3296_v13 = vld [vmem:[%s5819_s3 + $0x108] sm:$0xff] }
 0x590   :  { %3867 = vmatpush3.bf16.msra.mxu0 %v4846_v19 }
 0x591   :  { %3868 = vmatprep.subr.bf16.mxu0 %v5830_v46 }
 0x594   :  { %3869 = vmatpush3.bf16.msra.mxu0 %v4853_v40  ;;  %v4202_v34 = vpop.eup %4201 }
 0x595   :  { %3870 = vmatprep.subr.bf16.mxu0 %v5830_v46 }
 0x598   :  { %3871 = vmatpush3.bf16.msra.mxu0 %v4860_v41  ;;  %v889_v41 = vmul.f32 0.0, %v4202_v34 }
 0x599   :  { %3914 = vmatprep.subr.bf16.mxu0 %v5830_v46 }
 0x59b   :  { %v4204_v39 = vpop.eup %4203 }
 0x59c   :  { %v890_v31 = vmul.f32 0.0, %v4204_v39 }
 0x5b0   :  { %v894_v33 = vpop.permute.xlu0 %893 }
 0x5b1   :  { %v899_v19 = vmul.f32 %v4202_v34, %v894_v33 }
 0x5b3   :  { %903 = vrot.lane.b32.xlu0 %v899_v19, %s4304_s23 }
 0x5b4   :  { %v896_v40 = vpop.permute.xlu1 %895 }
 0x5b5   :  { %v900_v30 = vmul.f32 %v4204_v39, %v896_v40 }
 0x5b7   :  { %905 = vrot.lane.b32.xlu1 %v900_v30, %s4304_s23 }
 0x625   :  { %v904_v28 = vpop.permute.xlu0 %903 }
 0x626   :  { %v5009_v53 = vadd.f32 %v904_v28, %v889_v41 }
 0x628   :  { %4205 = vtanh.f32 %v5009_v53 }
 0x629   :  { %v906_v43 = vpop.permute.xlu1 %905 }
 0x62a   :  { %v5012_v45 = vadd.f32 %v906_v43, %v890_v31 }
 0x62c   :  { %4207 = vtanh.f32 %v5012_v45 }
 0x635   :  { %v4206_v1 = vpop.eup %4205 }
 0x636   :  { %915 = vrot.lane.b32.xlu0 %v4206_v1, %s4305_s24 }
 0x639   :  { %v4208_v59 = vpop.eup %4207 }
 0x63a   :  { %917 = vrot.lane.b32.xlu1 %v4208_v59, %s4305_s24 }
 0x63b   :  { %v1326_v5 = vpop.f32.mrf.mxu0 }
 0x63d   :  { %v3810_v54 = vpop.f32.mrf.mxu0 }
 0x63e   :  { %1915 = vperm.xlu1 %4137, %v3309_v42  }
 0x63f   :  { %v1329_v18 = vpop.f32.mrf.mxu0 }
 0x640   :  { %v1333_v23 = vpack.c.bf16 %v1329_v18, %v1326_v5 }
 0x641   :  { %v3811_v26 = vpop.f32.mrf.mxu0 }
 0x642   :  { %1905 = vperm.xlu1 %4137, %v3307_v16   ;;  %3812 = vmatprep.subr.bf16.mxu1 %v1333_v23 }
 0x643   :  { %3813 = vmatpush3.bf16.msra.mxu1 %v1333_v23 }
 0x644   :  { %3830 = vmatprep.subr.bf16.mxu1 %v5830_v46 }
 0x646   :  { %1895 = vperm.xlu1 %4137, %v3305_v27   ;;  %3815 = vmatmul.mubr.msk.bf16.vlgmr.msra.gmra.mxu1 %vm167_vm0, %v4795_v44  ;;  %v3299_v44 = vld [vmem:[%s5819_s3 + $0x120] sm:$0xff] }
 0x647   :  { %3818 = vmatprep.mubr.msk.bf16.mxu1 %vm167_vm0, %v4800_v62  ;;  %v3297_v62 = vld [vmem:[%s5819_s3 + $0x110] sm:$0xff] }
 0x64a   :  { %1885 = vperm.xlu1 %4137, %v3303_v58  }
 0x64e   :  { %1875 = vperm.xlu1 %4137, %v3301_v36   ;;  %3819 = vmatmul.mubr.msk.bf16.gmra.mxu1 %vm167_vm0, %v4809_v0  ;;  %v3295_v0 = vld [vmem:[%s5819_s3 + $0x100] sm:$0xff] }
 0x64f   :  { %3822 = vmatprep.mubr.msk.bf16.mxu1 %vm167_vm0, %v4814_v3  ;;  %v3293_v3 = vld [vmem:[%s5818_s2 + $0x20] sm:$0xff] }
 0x652   :  { %1865 = vperm.xlu1 %4137, %v3299_v44  }
 0x656   :  { %1855 = vperm.xlu1 %4137, %v3297_v62   ;;  %3823 = vmatmul.mubr.msk.bf16.gmra.mxu1 %vm167_vm0, %v4823_v9 }
 0x657   :  { %3826 = vmatprep.mubr.msk.bf16.mxu1 %vm167_vm0, %v4828_v52  ;;  %v3310_v52 = vld [vmem:[%s5819_s3 + $0x178] sm:$0xff] }
 0x65a   :  { %1845 = vperm.xlu1 %4137, %v3295_v0  }
 0x65e   :  { %1996 = vperm.xlu1 %4137, %v3293_v3   ;;  %3827 = vmatmul.mubr.msk.bf16.gmra.mxu1 %vm167_vm0, %v4837_v14  ;;  %v3308_v14 = vld [vmem:[%s5819_s3 + $0x168] sm:$0xff] }
 0x65f   :  { %3846 = vmatprep.mubr.msk.bf16.mxu1 %vm4302_vm1, %v5830_v46 }
 0x6a8   :  { %v916_v9 = vpop.permute.xlu0 %915 }
 0x6a9   :  { %v921_v6 = vmul.f32 %v4202_v34, %v916_v9  ;;  %v3294_v34 = vld [vmem:[%s5818_s2 + $0x28] sm:$0xff] }
 0x6ac   :  { %v918_v63 = vpop.permute.xlu1 %917 }
 0x6ad   :  { %v922_v21 = vmul.f32 %v4204_v39, %v918_v63 }
 0x6af   :  { %v1503_v47 = vpack.c.bf16 %v922_v21, %v921_v6 }
 0x6b1   :  { %1505 = vrot.lane.b32.xlu0 %v1503_v47, %s4306_s29  ;;  %v5164_v47 = vld [vmem:[%s5817_s1 + $0xa8] sm:$0xff]  }
 0x6b5   :  { %1920 = vperm.xlu0 %4136, %v3310_v52   ;;  %v5169_v52 = vld [vmem:[%s5817_s1 + $0xb0] sm:$0xff]  }
 0x6b9   :  { %1910 = vperm.xlu0 %4136, %v3308_v14   ;;  %v5178_v14 = vld [vmem:[%s5817_s1 + $0xb8] sm:$0xff]  }
 0x6bd   :  { %1900 = vperm.xlu0 %4136, %v3306_v17  }
 0x6c1   :  { %1890 = vperm.xlu0 %4136, %v3304_v2  }
 0x6c5   :  { %1880 = vperm.xlu0 %4136, %v3302_v4  }
 0x6c9   :  { %1870 = vperm.xlu0 %4136, %v3300_v7  }
 0x6cd   :  { %1860 = vperm.xlu0 %4136, %v3298_v8  }
 0x6d1   :  { %1850 = vperm.xlu0 %4136, %v3296_v13  }
 0x6d5   :  { %2001 = vperm.xlu0 %4136, %v3294_v34  }
 0x706   :  { %v3816_v33 = vpop.f32.mrf.mxu1 }
 0x707   :  { %v1433_v6 = vmul.f32 %v3816_v33, %v4945_v51 }
 0x708   :  { %v1368_v19 = vpop.f32.mrf.mxu1 }
 0x709   :  { %v1431_v21 = vmul.f32 %v1368_v19, %v4957_v25  ;;  %v5150_v25 = vld [vmem:[%s5817_s1 + $0x98] sm:$0xff]  }
 0x70a   :  { %v3817_v39 = vpop.f32.mrf.mxu1 }
 0x70c   :  { %v1371_v40 = vpop.f32.mrf.mxu1 }
 0x70e   :  { %v3820_v30 = vpop.f32.mrf.mxu1 }
 0x70f   :  { %v1437_v9 = vmul.f32 %v3820_v30, %v4928_v57  ;;  %v1432_v57 = vmul.f32 %v1371_v40, %v4952_v55  ;;  %v5141_v55 = vld [vmem:[%s5817_s1 + $0x90] sm:$0xff]  }
 0x710   :  { %v1384_v41 = vpop.f32.mrf.mxu1 }
 0x711   :  { %v1435_v63 = vmul.f32 %v1384_v41, %v4937_v10  ;;  %v5120_v10 = vld [vmem:[%s5820_s4] sm:$0xff]  }
 0x712   :  { %v3821_v28 = vpop.f32.mrf.mxu1 }
 0x714   :  { %v1387_v31 = vpop.f32.mrf.mxu1 }
 0x716   :  { %v3824_v43 = vpop.f32.mrf.mxu1 }
 0x717   :  { %v1441_v0 = vmul.f32 %v3824_v43, %v4911_v37  ;;  %v1436_v37 = vmul.f32 %v1387_v31, %v4933_v22  ;;  %v1447_v22 = vpack.c.bf16 %v1432_v57, %v1431_v21  ;;  %v5208_v43 = vld [vmem:[%s5822_s6 + $0x30] sm:$0xff]  }
 0x718   :  { %v1400_v1 = vpop.f32.mrf.mxu1 }
 0x719   :  { %v1439_v3 = vmul.f32 %v1400_v1, %v4920_v35  ;;  %v1449_v35 = vpack.c.bf16 %v1436_v37, %v1435_v63  ;;  %v5268_v63 = vld [vmem:[%s5822_s6] sm:$0xff]  }
 0x71a   :  { %v3825_v59 = vpop.f32.mrf.mxu1 }
 0x71b   :  { %v1442_v44 = vmul.f32 %v3825_v59, %v4909_v15 }
 0x71c   :  { %v1403_v5 = vpop.f32.mrf.mxu1 }
 0x71e   :  { %v3828_v42 = vpop.f32.mrf.mxu1 }
 0x71f   :  { %v1445_v16 = vmul.f32 %v3828_v42, %v4897_v48  ;;  %v1452_v48 = vpack.c.bf16 %v1442_v44, %v1441_v0  ;;  %v5248_v0 = vld [vmem:[%s5822_s6 + $0x10] sm:$0xff]  }
 0x720   :  { %v1416_v54 = vpop.f32.mrf.mxu1 }
 0x721   :  { %v1443_v36 = vmul.f32 %v1416_v54, %v4905_v50 }
 0x722   :  { %v3829_v18 = vpop.f32.mrf.mxu1 }
 0x723   :  { %v1446_v23 = vmul.f32 %v3829_v18, %v4895_v60  ;;  %v1440_v60 = vmul.f32 %v1403_v5, %v4917_v29  ;;  %v1434_v29 = vmul.f32 %v3817_v39, %v4942_v11  ;;  %v5126_v11 = vld [vmem:[%s5817_s1 + $0x80] sm:$0xff]   ;;  %v1506_v51 = vpop.permute.xlu0 %1505  ;;  %v5219_v5 = vld [vmem:[%s5822_s6 + $0x28] sm:$0xff]  }
 0x724   :  { %v1419_v26 = vpop.f32.mrf.mxu1  ;;  %v5228_v18 = vld [vmem:[%s5822_s6 + $0x20] sm:$0xff]  }
 0x725   :  { %v1454_v27 = vpack.c.bf16 %v1446_v23, %v1445_v16  ;;  %v1444_v58 = vmul.f32 %v1419_v26, %v4901_v49  ;;  %v1438_v49 = vmul.f32 %v3821_v28, %v4925_v61  ;;  %v1451_v50 = vpack.c.bf16 %v1440_v60, %v1439_v3  ;;  %v5234_v26 = vpop.permute.xlu1 %1915 }
 0x726   :  { %v1448_v61 = vpack.c.bf16 %v1434_v29, %v1433_v6 }
 0x727   :  { %3831 = vmatpush3.bf16.msra.mxu1 %v1454_v27  ;;  %v1453_v62 = vpack.c.bf16 %v1444_v58, %v1443_v36  ;;  %v1450_v15 = vpack.c.bf16 %v1438_v49, %v1437_v9  ;;  %v5239_v58 = vld [vmem:[%s5822_s6 + $0x18] sm:$0xff]   ;;  %v5257_v49 = vld [vmem:[%s5822_s6 + $0x8] sm:$0xff]  }
 0x728   :  { %3832 = vmatprep.subr.bf16.mxu1 %v5830_v46 }
 0x72b   :  { %3833 = vmatpush3.bf16.msra.mxu1 %v1453_v62 }
 0x72c   :  { %3834 = vmatprep.subr.bf16.mxu1 %v5830_v46 }
 0x72f   :  { %3835 = vmatpush3.bf16.msra.mxu1 %v1452_v48  ;;  %v5252_v48 = vpop.permute.xlu1 %1905 }
 0x730   :  { %3836 = vmatprep.subr.bf16.mxu1 %v5830_v46  ;;  %v5232_v16 = vpop.permute.xlu0 %1920 }
 0x733   :  { %3837 = vmatpush3.bf16.msra.mxu1 %v1451_v50 }
 0x734   :  { %3838 = vmatprep.subr.bf16.mxu1 %v5830_v46  ;;  %v5243_v44 = vpop.permute.xlu0 %1910 }
 0x737   :  { %3839 = vmatpush3.bf16.msra.mxu1 %v1450_v15  ;;  %v5263_v15 = vpop.permute.xlu1 %1895 }
 0x738   :  { %3840 = vmatprep.subr.bf16.mxu1 %v5830_v46  ;;  %v5261_v50 = vpop.permute.xlu0 %1900 }
 0x73b   :  { %3841 = vmatpush3.bf16.msra.mxu1 %v1449_v35 }
 0x73c   :  { %3842 = vmatprep.subr.bf16.mxu1 %v5830_v46 }
 0x73f   :  { %3843 = vmatpush3.bf16.msra.mxu1 %v1448_v61  ;;  %v5274_v61 = vpop.permute.xlu0 %1890 }
 0x740   :  { %3844 = vmatprep.subr.bf16.mxu1 %v5830_v46 }
 0x743   :  { %3845 = vmatpush3.bf16.msra.mxu1 %v1447_v22 }
 0x744   :  { %3850 = vmatprep.subr.bf16.mxu1 %v5830_v46 }
 0x746   :  { %3847 = vmatmul.mubr.bf16.vlgmr.msra.gmra.mxu1 %v4965_v20  ;;  %v5155_v20 = vld [vmem:[%s5817_s1 + $0xa0] sm:$0xff]  }
 0x747   :  { %3851 = vmatpush3.bf16.msra.mxu1 %v4774_v38  ;;  %3852 = vmatprep.mubr.msk.bf16.mxu1 %vm4302_vm1, %v5830_v46  ;;  %v5136_v38 = vld [vmem:[%s5817_s1 + $0x88] sm:$0xff]  }
 0x748   :  { %3876 = vmatprep.subr.bf16.mxu1 %v5120_v10 }
 0x74e   :  { %3853 = vmatmul.mubr.msk.bf16.vlgmr.msra.gmra.mxu1 %vm167_vm0, %v1506_v51  ;;  %v5277_v51 = vpop.permute.xlu1 %1885 }
 0x74f   :  { %3877 = vmatpush3.bf16.msra.mxu1 %v5120_v10  ;;  %3878 = vmatprep.mubr.msk.bf16.mxu1 %vm167_vm0, %v5126_v11 }
 0x750   :  { %3894 = vmatprep.subr.bf16.mxu1 %v5830_v46 }
 0x756   :  { %3879 = vmatmul.mubr.msk.bf16.vlgmr.msra.gmra.mxu1 %vm167_vm0, %v5136_v38 }
 0x757   :  { %3882 = vmatprep.mubr.msk.bf16.mxu1 %vm167_vm0, %v5141_v55 }
 0x75e   :  { %3883 = vmatmul.mubr.msk.bf16.gmra.mxu1 %vm167_vm0, %v5150_v25 }
 0x75f   :  { %3886 = vmatprep.mubr.msk.bf16.mxu1 %vm167_vm0, %v5155_v20 }
 0x766   :  { %3887 = vmatmul.mubr.msk.bf16.gmra.mxu1 %vm167_vm0, %v5164_v47 }
 0x767   :  { %3890 = vmatprep.mubr.msk.bf16.mxu1 %vm167_vm0, %v5169_v52 }
 0x76e   :  { %3891 = vmatmul.mubr.msk.bf16.gmra.mxu1 %vm167_vm0, %v5178_v14 }
 0x76f   :  { %3910 = vmatprep.mubr.msk.bf16.mxu1 %vm4302_vm1, %v5830_v46 }
 0x806   :  { %v1489_v17 = vpop.f32.mrf.mxu1 }
 0x807   :  { %v1496_v2 = vmul.f32 %v1489_v17, %v4981_v12  ;;  %v5195_v12 = vld [vmem:[%s5822_s6 + $0x38] sm:$0xff]  }
 0x808   :  { %v3848_v4 = vpop.f32.mrf.mxu1 }
 0x809   :  { %v1498_v8 = vadd.f32 %v4868_v56, %v1496_v2 }
 0x80a   :  { %v1492_v7 = vpop.f32.mrf.mxu1 }
 0x80b   :  { %v1497_v13 = vmul.f32 %v1492_v7, %v4984_v24  ;;  %v1500_v39 = vmax.f32 %v1498_v8, 0.0  ;;  %v5282_v7 = vpop.permute.xlu0 %1880 }
 0x80c   :  { %v3849_v34 = vpop.f32.mrf.mxu1 }
 0x80d   :  { %v1499_v33 = vadd.f32 %v4868_v56, %v1497_v13  ;;  %v5285_v13 = vpop.permute.xlu1 %1875 }
 0x80e   :  { %v5188_v19 = vpop.f32.mrf.mxu1 }
 0x80f   :  { %v1501_v40 = vmax.f32 %v1499_v33, 0.0 }
 0x810   :  { %v3854_v30 = vpop.f32.mrf.mxu1 }
 0x811   :  { %v1502_v41 = vpack.c.bf16 %v1501_v40, %v1500_v39  ;;  %v5290_v40 = vpop.permute.xlu0 %1870 }
 0x812   :  { %v5190_v28 = vpop.f32.mrf.mxu1 }
 0x813   :  { %3873 = vmatmul.mubr.bf16.vlgmr.msra.gmra.mxu0 %v1502_v41 }
 0x814   :  { %v3855_v31 = vpop.f32.mrf.mxu1  ;;  %3915 = vmatpush3.bf16.msra.mxu0 %v5195_v12  ;;  %3930 = vmatprep.mubr.msk.bf16.mxu0 %vm4302_vm1, %v5830_v46 }
 0x815   :  { %3916 = vmatprep.subr.bf16.mxu0 %v5830_v46  ;;  %v5294_v31 = vpop.permute.xlu1 %1865 }
 0x816   :  { %v5201_v56 = vpop.f32.mrf.mxu1 }
 0x818   :  { %v5203_v24 = vpop.f32.mrf.mxu1  ;;  %3917 = vmatpush3.bf16.msra.mxu0 %v5208_v43 }
 0x819   :  { %3918 = vmatprep.subr.bf16.mxu0 %v5830_v46 }
 0x81a   :  { %v5212_v1 = vpop.f32.mrf.mxu1 }
 0x81c   :  { %v5214_v59 = vpop.f32.mrf.mxu1  ;;  %3919 = vmatpush3.bf16.msra.mxu0 %v5219_v5 }
 0x81d   :  { %3920 = vmatprep.subr.bf16.mxu0 %v5830_v46 }
 0x81e   :  { %v3884_v42 = vpop.f32.mrf.mxu1 }
 0x820   :  { %v5223_v54 = vpop.f32.mrf.mxu1  ;;  %3921 = vmatpush3.bf16.msra.mxu0 %v5228_v18 }
 0x821   :  { %3922 = vmatprep.subr.bf16.mxu0 %v5830_v46 }
 0x822   :  { %v3885_v23 = vpop.f32.mrf.mxu1 }
 0x823   :  { %v1930_v30 = vmul.f32 %v3885_v23, %v5282_v7 }
 0x824   :  { %v1799_v27 = vpop.f32.mrf.mxu1  ;;  %3923 = vmatpush3.bf16.msra.mxu0 %v5239_v58 }
 0x825   :  { %3924 = vmatprep.subr.bf16.mxu0 %v5830_v46 }
 0x826   :  { %v3888_v36 = vpop.f32.mrf.mxu1 }
 0x827   :  { %v1933_v8 = vmul.f32 %v3888_v36, %v5263_v15  ;;  %v1929_v36 = vmul.f32 %v3884_v42, %v5285_v13 }
 0x828   :  { %v1812_v62 = vpop.f32.mrf.mxu1  ;;  %3925 = vmatpush3.bf16.msra.mxu0 %v5248_v0 }
 0x829   :  { %3926 = vmatprep.subr.bf16.mxu0 %v5830_v46  ;;  %v1931_v39 = vmul.f32 %v5277_v51, %v1812_v62  ;;  %v1927_v62 = vmul.f32 %v5294_v31, %v5223_v54 }
 0x82a   :  { %v3889_v60 = vpop.f32.mrf.mxu1 }
 0x82b   :  { %v1934_v2 = vmul.f32 %v3889_v60, %v5261_v50  ;;  %v1942_v60 = vpack.c.bf16 %v1930_v30, %v1929_v36  ;;  %v3367_v30 = vld [vmem:[%s5819_s3 + $0x1c0] sm:$0xff]  ;;  %v3365_v36 = vld [vmem:[%s5819_s3 + $0x1b0] sm:$0xff] }
 0x82c   :  { %v1815_v3 = vpop.f32.mrf.mxu1  ;;  %3927 = vmatpush3.bf16.msra.mxu0 %v5257_v49 }
 0x82d   :  { %3928 = vmatprep.subr.bf16.mxu0 %v5830_v46  ;;  %v1944_v34 = vpack.c.bf16 %v1934_v2, %v1933_v8  ;;  %v1932_v33 = vmul.f32 %v5274_v61, %v1815_v3  ;;  %v1928_v3 = vmul.f32 %v5290_v40, %v1799_v27 }
 0x82e   :  { %v3892_v9 = vpop.f32.mrf.mxu1 }
 0x82f   :  { %v1937_v35 = vmul.f32 %v3892_v9, %v5234_v26  ;;  %v1943_v41 = vpack.c.bf16 %v1932_v33, %v1931_v39  ;;  %v5299_v9 = vpop.permute.xlu0 %1860  ;;  %v1941_v42 = vpack.c.bf16 %v1928_v3, %v1927_v62  ;;  %v3372_v39 = vld [vmem:[%s5819_s3 + $0x1e8] sm:$0xff]  ;;  %v3363_v3 = vld [vmem:[%s5819_s3 + $0x1a0] sm:$0xff]  ;;  %v3366_v62 = vld [vmem:[%s5819_s3 + $0x1b8] sm:$0xff] }
 0x830   :  { %v1828_v37 = vpop.f32.mrf.mxu1  ;;  %3929 = vmatpush3.bf16.msra.mxu0 %v5268_v63  ;;  %v1926_v23 = vmul.f32 %v5212_v1, %v5299_v9 }
 0x831   :  { %3972 = vmatprep.subr.bf16.mxu0 %v5830_v46  ;;  %v1935_v17 = vmul.f32 %v5252_v48, %v1828_v37  ;;  %v5303_v37 = vpop.permute.xlu1 %1855 }
 0x832   :  { %v3893_v29 = vpop.f32.mrf.mxu1 }
 0x833   :  { %v1938_v6 = vmul.f32 %v3893_v29, %v5232_v16  ;;  %v1925_v29 = vmul.f32 %v5201_v56, %v5303_v37  ;;  %v5323_v56 = vld [vmem:[%s5816_s0 + $0x10] sm:$0xff]  }
 0x834   :  { %v1831_v57 = vpop.f32.mrf.mxu1 }
 0x835   :  { %v1946_v21 = vpack.c.bf16 %v1938_v6, %v1937_v35  ;;  %v1936_v22 = vmul.f32 %v5243_v44, %v1831_v57  ;;  %v5310_v35 = vpop.permute.xlu0 %1850  ;;  %v1940_v27 = vpack.c.bf16 %v1926_v23, %v1925_v29  ;;  %v5315_v6 = vpop.permute.xlu1 %1845  ;;  %v3361_v23 = vld [vmem:[%s5819_s3 + $0x190] sm:$0xff]  ;;  %v3359_v29 = vld [vmem:[%s5819_s3 + $0x180] sm:$0xff] }
 0x836   :  { %v1924_v54 = vmul.f32 %v5310_v35, %v5214_v59  ;;  %v1923_v57 = vmul.f32 %v5315_v6, %v5203_v24 }
 0x837   :  { %3895 = vmatpush3.bf16.msra.mxu1 %v1946_v21  ;;  %v1945_v4 = vpack.c.bf16 %v1936_v22, %v1935_v17 }
 0x838   :  { %3896 = vmatprep.subr.bf16.mxu1 %v5830_v46  ;;  %v1939_v1 = vpack.c.bf16 %v1924_v54, %v1923_v57  ;;  %v3360_v54 = vld [vmem:[%s5819_s3 + $0x188] sm:$0xff] }
 0x839   :  { %v5382_v57 = vpop.permute.xlu1 %1996 }
 0x83b   :  { %3897 = vmatpush3.bf16.msra.mxu1 %v1945_v4 }
 0x83c   :  { %3898 = vmatprep.subr.bf16.mxu1 %v5830_v46 }
 0x83f   :  { %3899 = vmatpush3.bf16.msra.mxu1 %v1944_v34 }
 0x840   :  { %3900 = vmatprep.subr.bf16.mxu1 %v5830_v46 }
 0x843   :  { %3901 = vmatpush3.bf16.msra.mxu1 %v1943_v41  ;;  %v3370_v41 = vld [vmem:[%s5819_s3 + $0x1d8] sm:$0xff] }
 0x844   :  { %3902 = vmatprep.subr.bf16.mxu1 %v5830_v46 }
 0x847   :  { %3903 = vmatpush3.bf16.msra.mxu1 %v1942_v60  ;;  %v3368_v60 = vld [vmem:[%s5819_s3 + $0x1c8] sm:$0xff] }
 0x848   :  { %3904 = vmatprep.subr.bf16.mxu1 %v5830_v46 }
 0x84b   :  { %3905 = vmatpush3.bf16.msra.mxu1 %v1941_v42  ;;  %v3364_v42 = vld [vmem:[%s5819_s3 + $0x1a8] sm:$0xff] }
 0x84c   :  { %3906 = vmatprep.subr.bf16.mxu1 %v5830_v46 }
 0x84f   :  { %3907 = vmatpush3.bf16.msra.mxu1 %v1940_v27  ;;  %v3362_v27 = vld [vmem:[%s5819_s3 + $0x198] sm:$0xff] }
 0x850   :  { %3908 = vmatprep.subr.bf16.mxu1 %v5830_v46 }
 0x853   :  { %3909 = vmatpush3.bf16.msra.mxu1 %v1939_v1 }
 0x856   :  { %3911 = vmatmul.mubr.bf16.vlgmr.msra.gmra.mxu1 %v5323_v56 }
 0x857   :  { %3936 = vmatprep.mubr.msk.bf16.mxu1 %vm167_vm0, %v5126_v11  ;;  %v3373_v11 = vld [vmem:[%s5819_s3 + $0x1f0] sm:$0xff] }
 0x8d3   :  { %v1585_v59 = vpop.f32.mrf.mxu0 }
 0x8d4   :  { %v1586_v21 = vadd.f32 %v1585_v59, %v5188_v19  ;;  %v3371_v19 = vld [vmem:[%s5819_s3 + $0x1e0] sm:$0xff] }
 0x8d5   :  { %v3874_v22 = vpop.f32.mrf.mxu0 }
 0x8d6   :  { %v1592_v24 = vadd.f32 %v4973_v32, %v1586_v21  ;;  %v5385_v22 = vpop.permute.xlu0 %2001 }
 0x8d7   :  { %v1588_v17 = vpop.f32.mrf.mxu0 }
 0x8d8   :  { %4209 = vtanh.f32 %v1592_v24  ;;  %v1589_v2 = vadd.f32 %v1588_v17, %v5190_v28  ;;  %v3369_v28 = vld [vmem:[%s5819_s3 + $0x1d0] sm:$0xff] }
 0x8d9   :  { %v3875_v4 = vpop.f32.mrf.mxu0 }
 0x8da   :  { %v1593_v8 = vadd.f32 %v4973_v32, %v1589_v2  ;;  %v3374_v32 = vld [vmem:[%s5819_s3 + $0x1f8] sm:$0xff]  ;;  %v5390_v2 = vld [vmem:[%s5821_s5] ss:$0 sm:$0xff] }
 0x8db   :  { %5840 = vst [vmem:[#allocation5_spill] sm:$0xff] %v5390_v2 }
 0x8dc   :  { %4211 = vtanh.f32 %v1593_v8 }
 0x8e5   :  { %v4210_v34 = vpop.eup %4209 }
 0x8e6   :  { %1612 = vrot.lane.b32.xlu1 %v4210_v34, %s4303_s22 }
 0x8e9   :  { %v4212_v33 = vpop.eup %4211 }
 0x8ea   :  { %2634 = vperm.xlu1 %4137, %v3373_v11   ;;  %1614 = vrot.lane.b32.xlu0 %v4212_v33, %s4303_s22 }
 0x8ee   :  { %2624 = vperm.xlu1 %4137, %v3371_v19   ;;  %2639 = vperm.xlu0 %4136, %v3374_v32  }
 0x8f2   :  { %2614 = vperm.xlu1 %4137, %v3369_v28   ;;  %2629 = vperm.xlu0 %4136, %v3372_v39   ;;  %v5398_v39 = vld [vmem:[%s5825_s9] sm:$0xff]  }
 0x8f3   :  { %5841 = vst [vmem:[#allocation6_spill] sm:$0xff] %v5398_v39 }
 0x8f6   :  { %2604 = vperm.xlu1 %4137, %v3367_v30   ;;  %2619 = vperm.xlu0 %4136, %v3370_v41   ;;  %v3273_v30 = vmul.f32 -1.442695, %v1592_v24  ;;  %v3274_v41 = vmul.f32 -1.442695, %v1593_v8 }
 0x8f8   :  { %4213 = vpow2.f32 %v3273_v30 }
 0x8f9   :  { %4215 = vpow2.f32 %v3274_v41 }
 0x8fa   :  { %2594 = vperm.xlu1 %4137, %v3365_v36   ;;  %2609 = vperm.xlu0 %4136, %v3368_v60  }
 0x8fe   :  { %2584 = vperm.xlu1 %4137, %v3363_v3   ;;  %2599 = vperm.xlu0 %4136, %v3366_v62  }
 0x902   :  { %2574 = vperm.xlu1 %4137, %v3361_v23   ;;  %2589 = vperm.xlu0 %4136, %v3364_v42  }
 0x905   :  { %v4214_v36 = vpop.eup %4213 }
 0x906   :  { %2564 = vperm.xlu1 %4137, %v3359_v29   ;;  %2579 = vperm.xlu0 %4136, %v3362_v27   ;;  %v1600_v60 = vadd.f32 1.0, %v4214_v36  ;;  %v4216_v3 = vpop.eup %4215 }
 0x907   :  { %v1601_v62 = vadd.f32 1.0, %v4216_v3 }
 0x908   :  { %4217 = vrcp.f32 %v1600_v60 }
 0x909   :  { %4219 = vrcp.f32 %v1601_v62 }
 0x90a   :  { %2569 = vperm.xlu0 %4136, %v3360_v54  }
 0x915   :  { %v4218_v23 = vpop.eup %4217 }
 0x916   :  { %v1987_v1 = vpop.f32.mrf.mxu1  ;;  %v4220_v27 = vpop.eup %4219  ;;  %v1608_v60 = vmul.f32 %v4218_v23, %v5009_v53 }
 0x917   :  { %v2004_v59 = vmul.f32 %v5382_v57, %v1987_v1 }
 0x918   :  { %v3912_v21 = vpop.f32.mrf.mxu1 }
 0x919   :  { %v2006_v4 = vadd.f32 %v5390_v2, %v2004_v59 }
 0x91a   :  { %v1990_v17 = vpop.f32.mrf.mxu1 }
 0x91b   :  { %v2005_v34 = vmul.f32 %v5385_v22, %v1990_v17  ;;  %v2008_v19 = vmax.f32 %v2006_v4, 0.0 }
 0x91c   :  { %v3913_v11 = vpop.f32.mrf.mxu1 }
 0x91d   :  { %v2007_v33 = vadd.f32 %v5390_v2, %v2005_v34 }
 0x91f   :  { %v2009_v32 = vmax.f32 %v2007_v33, 0.0 }
 0x921   :  { %v2010_v28 = vpack.c.bf16 %v2009_v32, %v2008_v19 }
 0x923   :  { %3931 = vmatmul.mubr.bf16.vlgmr.msra.gmra.mxu0 %v2010_v28 }
 0x924   :  { %3973 = vmatpush3.bf16.msra.mxu0 %v5398_v39  ;;  %3974 = vmatprep.mubr.msk.bf16.mxu0 %vm4302_vm1, %v5830_v46 }
 0x925   :  { %3978 = vmatprep.subr.bf16.mxu0 %v5830_v46 }
 0x958   :  { %v1613_v42 = vpop.permute.xlu1 %1612 }
 0x959   :  { %v1618_v29 = vmul.f32 %v4218_v23, %v1613_v42 }
 0x95b   :  { %1622 = vrot.lane.b32.xlu1 %v1618_v29, %s4304_s23  ;;  %v1609_v29 = vmul.f32 %v4220_v27, %v5012_v45 }
 0x95c   :  { %v1615_v54 = vpop.permute.xlu0 %1614 }
 0x95d   :  { %v1619_v1 = vmul.f32 %v4220_v27, %v1615_v54 }
 0x95f   :  { %1624 = vrot.lane.b32.xlu0 %v1619_v1, %s4304_s23 }
 0x965   :  { %v5406_v24 = vpop.permute.xlu1 %2634 }
 0x969   :  { %v5408_v8 = vpop.permute.xlu0 %2639  ;;  %v5410_v59 = vpop.permute.xlu1 %2624 }
 0x96d   :  { %v5412_v21 = vpop.permute.xlu0 %2629  ;;  %v5414_v17 = vpop.permute.xlu1 %2614 }
 0x971   :  { %v5416_v4 = vpop.permute.xlu0 %2619  ;;  %v5418_v34 = vpop.permute.xlu1 %2604 }
 0x975   :  { %v5420_v11 = vpop.permute.xlu0 %2609  ;;  %v5422_v33 = vpop.permute.xlu1 %2594 }
 0x979   :  { %v5424_v19 = vpop.permute.xlu0 %2599  ;;  %v5426_v32 = vpop.permute.xlu1 %2584 }
 0x97d   :  { %v5428_v28 = vpop.permute.xlu0 %2589  ;;  %v5430_v30 = vpop.permute.xlu1 %2574 }
 0x97e   :  { %5842 = vst [vmem:[#allocation7_spill] sm:$0xff] %v5430_v30  ;;  %v5485_v30 = vld [vmem:[%s5824_s8 + $0x38] sm:$0xff]  }
 0x981   :  { %v5432_v41 = vpop.permute.xlu0 %2579  ;;  %v5434_v36 = vpop.permute.xlu1 %2564 }
 0x982   :  { %5843 = vst [vmem:[#allocation8_spill] sm:$0xff] %v5434_v36 }
 0x985   :  { %v5437_v3 = vpop.permute.xlu0 %2569 }
 0x986   :  { %5844 = vst [vmem:[#allocation9_spill] sm:$0xff] %v5437_v3 }
 0x9cd   :  { %v1623_v62 = vpop.permute.xlu1 %1622 }
 0x9ce   :  { %v5439_v42 = vadd.f32 %v1623_v62, %v1608_v60  ;;  %v3357_v60 = vld [vmem:[%s5818_s2 + $0x30] sm:$0xff] }
 0x9d0   :  { %5845 = vst [vmem:[#allocation10_spill] sm:$0xff] %v5439_v42  ;;  %4221 = vtanh.f32 %v5439_v42 }
 0x9d1   :  { %v1625_v54 = vpop.permute.xlu0 %1624 }
 0x9d2   :  { %v5443_v1 = vadd.f32 %v1625_v54, %v1609_v29  ;;  %v5847_v29 = vmov 0.0  }
 0x9d4   :  { %5846 = vst [vmem:[#allocation11_spill] sm:$0xff] %v5443_v1  ;;  %4223 = vtanh.f32 %v5443_v1 }
 0x9dd   :  { %v4222_v46 = vpop.eup %4221 }
 0x9de   :  { %1634 = vrot.lane.b32.xlu1 %v4222_v46, %s4305_s24 }
 0x9e1   :  { %v4224_v2 = vpop.eup %4223 }
 0x9e2   :  { %1636 = vrot.lane.b32.xlu0 %v4224_v2, %s4305_s24 }
 0x9e3   :  { %v2045_v53 = vpop.f32.mrf.mxu0 }
 0x9e5   :  { %v3932_v62 = vpop.f32.mrf.mxu0 }
 0x9e6   :  { %2715 = vperm.xlu0 %4136, %v3357_v60  }
 0x9e7   :  { %v2048_v42 = vpop.f32.mrf.mxu0 }
 0x9e8   :  { %v2052_v45 = vpack.c.bf16 %v2048_v42, %v2045_v53 }
 0x9e9   :  { %v3933_v39 = vpop.f32.mrf.mxu0 }
 0x9ea   :  { %3934 = vmatprep.subr.bf16.mxu1 %v2052_v45 }
 0x9eb   :  { %3935 = vmatpush3.bf16.msra.mxu1 %v2052_v45 }
 0x9ec   :  { %3952 = vmatprep.subr.bf16.mxu1 %v5847_v29 }
 0x9ee   :  { %3937 = vmatmul.mubr.msk.bf16.vlgmr.msra.gmra.mxu1 %vm167_vm0, %v5136_v38 }
 0x9ef   :  { %3940 = vmatprep.mubr.msk.bf16.mxu1 %vm167_vm0, %v5141_v55 }
 0x9f6   :  { %3941 = vmatmul.mubr.msk.bf16.gmra.mxu1 %vm167_vm0, %v5150_v25 }
 0x9f7   :  { %3944 = vmatprep.mubr.msk.bf16.mxu1 %vm167_vm0, %v5155_v20  ;;  %v3358_v20 = vld [vmem:[%s5818_s2 + $0x38] sm:$0xff] }
 0x9fe   :  { %3945 = vmatmul.mubr.msk.bf16.gmra.mxu1 %vm167_vm0, %v5164_v47 }
 0x9ff   :  { %3948 = vmatprep.mubr.msk.bf16.mxu1 %vm167_vm0, %v5169_v52 }
 0xa06   :  { %3949 = vmatmul.mubr.msk.bf16.gmra.mxu1 %vm167_vm0, %v5178_v14 }
 0xa07   :  { %3968 = vmatprep.mubr.msk.bf16.mxu1 %vm4302_vm1, %v5847_v29 }
 0xa50   :  { %v1635_v46 = vpop.permute.xlu1 %1634 }
 0xa51   :  { %v1640_v55 = vmul.f32 %v4218_v23, %v1635_v46 }
 0xa54   :  { %v1637_v38 = vpop.permute.xlu0 %1636 }
 0xa55   :  { %v1641_v2 = vmul.f32 %v4220_v27, %v1637_v38 }
 0xa57   :  { %v2222_v25 = vpack.c.bf16 %v1641_v2, %v1640_v55 }
 0xa59   :  { %2224 = vrot.lane.b32.xlu1 %v2222_v25, %s4306_s29 }
 0xa5d   :  { %2720 = vperm.xlu1 %4137, %v3358_v20  }
 0xaae   :  { %v5472_v47 = vpop.f32.mrf.mxu1 }
 0xab0   :  { %v5474_v52 = vpop.f32.mrf.mxu1 }
 0xab2   :  { %v3939_v14 = vpop.f32.mrf.mxu1 }
 0xab4   :  { %v5476_v39 = vpop.f32.mrf.mxu1 }
 0xab6   :  { %v3942_v42 = vpop.f32.mrf.mxu1 }
 0xab8   :  { %v2103_v54 = vpop.f32.mrf.mxu1 }
 0xaba   :  { %v3943_v53 = vpop.f32.mrf.mxu1 }
 0xabc   :  { %v2106_v23 = vpop.f32.mrf.mxu1 }
 0xabe   :  { %v3946_v27 = vpop.f32.mrf.mxu1 }
 0xac0   :  { %v2119_v60 = vpop.f32.mrf.mxu1 }
 0xac2   :  { %v3947_v62 = vpop.f32.mrf.mxu1 }
 0xac4   :  { %v2122_v45 = vpop.f32.mrf.mxu1 }
 0xac6   :  { %v3950_v46 = vpop.f32.mrf.mxu1 }
 0xac7   :  { %v2164_v2 = vmul.f32 %v3950_v46, %v5234_v26  ;;  %v2161_v26 = vmul.f32 %v3947_v62, %v5261_v50  ;;  %v2160_v46 = vmul.f32 %v3946_v27, %v5263_v15  ;;  %v5507_v50 = vld [vmem:[%s5824_s8 + $0x28] sm:$0xff]   ;;  %v2157_v15 = vmul.f32 %v3943_v53, %v5282_v7  ;;  %v5527_v7 = vld [vmem:[%s5824_s8 + $0x18] sm:$0xff]  }
 0xac8   :  { %v2135_v38 = vpop.f32.mrf.mxu1  ;;  %v2156_v62 = vmul.f32 %v3942_v42, %v5285_v13  ;;  %v2154_v53 = vmul.f32 %v2103_v54, %v5294_v31  ;;  %v2153_v13 = vmul.f32 %v3939_v14, %v5299_v9  ;;  %v2151_v9 = vmul.f32 %v5476_v39, %v5310_v35  ;;  %v5549_v14 = vld [vmem:[%s5824_s8 + $0x8] sm:$0xff]   ;;  %v5559_v35 = vld [vmem:[%s5824_s8] sm:$0xff]  }
 0xac9   :  { %v2150_v54 = vmul.f32 %v5474_v52, %v5315_v6  ;;  %v5577_v6 = vld [vmem:[%s5817_s1 + $0xc8] sm:$0xff]   ;;  %v5582_v52 = vld [vmem:[%s5817_s1 + $0xd0] sm:$0xff]  }
 0xaca   :  { %v3951_v55 = vpop.f32.mrf.mxu1  ;;  %v5605_v39 = vld [vmem:[%s5817_s1 + $0xe8] sm:$0xff]  }
 0xacb   :  { %v2165_v25 = vmul.f32 %v3951_v55, %v5232_v16  ;;  %v2225_v20 = vpop.permute.xlu1 %2224  ;;  %v2162_v16 = vmul.f32 %v2135_v38, %v5252_v48  ;;  %v2171_v48 = vpack.c.bf16 %v2161_v26, %v2160_v46  ;;  %v5619_v38 = vld [vmem:[%s5817_s1 + $0xf8] sm:$0xff]  }
 0xacc   :  { %v2138_v1 = vpop.f32.mrf.mxu1  ;;  %3975 = vmatmul.mubr.msk.bf16.vlgmr.msra.gmra.mxu0 %vm167_vm0, %v2225_v20 }
 0xacd   :  { %v2173_v36 = vpack.c.bf16 %v2165_v25, %v2164_v2  ;;  %v2163_v3 = vmul.f32 %v2138_v1, %v5243_v44  ;;  %3979 = vmatpush3.bf16.msra.mxu0 %v5485_v30  ;;  %3994 = vmatprep.mubr.msk.bf16.mxu0 %vm4302_vm1, %v5847_v29  ;;  %v5497_v1 = vld [vmem:[%s5824_s8 + $0x30] sm:$0xff]  }
 0xace   :  { %3980 = vmatprep.subr.bf16.mxu0 %v5847_v29 }
 0xacf   :  { %3953 = vmatpush3.bf16.msra.mxu1 %v2173_v36  ;;  %v2172_v44 = vpack.c.bf16 %v2163_v3, %v2162_v16  ;;  %v2159_v36 = vmul.f32 %v2122_v45, %v5274_v61  ;;  %v2158_v3 = vmul.f32 %v2119_v60, %v5277_v51  ;;  %v5517_v61 = vld [vmem:[%s5824_s8 + $0x20] sm:$0xff]   ;;  %v2169_v51 = vpack.c.bf16 %v2157_v15, %v2156_v62  ;;  %v5610_v45 = vld [vmem:[%s5817_s1 + $0xf0] sm:$0xff]  }
 0xad0   :  { %3954 = vmatprep.subr.bf16.mxu1 %v5847_v29  ;;  %v2155_v60 = vmul.f32 %v2106_v23, %v5290_v40  ;;  %v5537_v40 = vld [vmem:[%s5824_s8 + $0x10] sm:$0xff]   ;;  %v2152_v23 = vmul.f32 %v5472_v47, %v5303_v37  ;;  %v2166_v37 = vpack.c.bf16 %v2151_v9, %v2150_v54  ;;  %v5566_v47 = vld [vmem:[%s5817_s1 + $0xc0] sm:$0xff]  }
 0xad1   :  { %3981 = vmatpush3.bf16.msra.mxu0 %v5497_v1  ;;  %v2170_v27 = vpack.c.bf16 %v2159_v36, %v2158_v3 }
 0xad2   :  { %3982 = vmatprep.subr.bf16.mxu0 %v5847_v29  ;;  %v2168_v42 = vpack.c.bf16 %v2155_v60, %v2154_v53  ;;  %v2167_v31 = vpack.c.bf16 %v2153_v13, %v2152_v23 }
 0xad3   :  { %3955 = vmatpush3.bf16.msra.mxu1 %v2172_v44 }
 0xad4   :  { %3956 = vmatprep.subr.bf16.mxu1 %v5847_v29 }
 0xad5   :  { %3983 = vmatpush3.bf16.msra.mxu0 %v5507_v50 }
 0xad6   :  { %3984 = vmatprep.subr.bf16.mxu0 %v5847_v29 }
 0xad7   :  { %3957 = vmatpush3.bf16.msra.mxu1 %v2171_v48  ;;  %v5633_v48 = vld [vmem:[%s5823_s7] ss:$0 sm:$0xff] }
 0xad8   :  { %3958 = vmatprep.subr.bf16.mxu1 %v5847_v29 }
 0xad9   :  { %3985 = vmatpush3.bf16.msra.mxu0 %v5517_v61 }
 0xada   :  { %3986 = vmatprep.subr.bf16.mxu0 %v5847_v29 }
 0xadb   :  { %3959 = vmatpush3.bf16.msra.mxu1 %v2170_v27 }
 0xadc   :  { %3960 = vmatprep.subr.bf16.mxu1 %v5847_v29 }
 0xadd   :  { %3987 = vmatpush3.bf16.msra.mxu0 %v5527_v7 }
 0xade   :  { %3988 = vmatprep.subr.bf16.mxu0 %v5847_v29 }
 0xadf   :  { %3961 = vmatpush3.bf16.msra.mxu1 %v2169_v51 }
 0xae0   :  { %3962 = vmatprep.subr.bf16.mxu1 %v5847_v29 }
 0xae1   :  { %3989 = vmatpush3.bf16.msra.mxu0 %v5537_v40 }
 0xae2   :  { %3990 = vmatprep.subr.bf16.mxu0 %v5847_v29 }
 0xae3   :  { %3963 = vmatpush3.bf16.msra.mxu1 %v2168_v42 }
 0xae4   :  { %3964 = vmatprep.subr.bf16.mxu1 %v5847_v29 }
 0xae5   :  { %3991 = vmatpush3.bf16.msra.mxu0 %v5549_v14 }
 0xae6   :  { %3992 = vmatprep.subr.bf16.mxu0 %v5847_v29 }
 0xae7   :  { %3965 = vmatpush3.bf16.msra.mxu1 %v2167_v31 }
 0xae8   :  { %3966 = vmatprep.subr.bf16.mxu1 %v5847_v29 }
 0xae9   :  { %3993 = vmatpush3.bf16.msra.mxu0 %v5559_v35 }
 0xaea   :  { %4036 = vmatprep.subr.bf16.mxu0 %v5847_v29 }
 0xaeb   :  { %3967 = vmatpush3.bf16.msra.mxu1 %v2166_v37 }
 0xaec   :  { %3998 = vmatprep.subr.bf16.mxu1 %v5120_v10 }
 0xaee   :  { %3969 = vmatmul.mubr.bf16.vlgmr.msra.gmra.mxu1 %v5323_v56  ;;  %v5596_v56 = vld [vmem:[%s5817_s1 + $0xe0] sm:$0xff]  }
 0xaef   :  { %3999 = vmatpush3.bf16.msra.mxu1 %v5120_v10  ;;  %4000 = vmatprep.mubr.msk.bf16.mxu1 %vm167_vm0, %v5566_v47  ;;  %v5591_v10 = vld [vmem:[%s5817_s1 + $0xd8] sm:$0xff]  }
 0xaf0   :  { %4016 = vmatprep.subr.bf16.mxu1 %v5847_v29 }
 0xaf6   :  { %4001 = vmatmul.mubr.msk.bf16.vlgmr.msra.gmra.mxu1 %vm167_vm0, %v5577_v6 }
 0xaf7   :  { %4004 = vmatprep.mubr.msk.bf16.mxu1 %vm167_vm0, %v5582_v52 }
 0xafe   :  { %4005 = vmatmul.mubr.msk.bf16.gmra.mxu1 %vm167_vm0, %v5591_v10 }
 0xaff   :  { %4008 = vmatprep.mubr.msk.bf16.mxu1 %vm167_vm0, %v5596_v56 }
 0xb06   :  { %4009 = vmatmul.mubr.msk.bf16.gmra.mxu1 %vm167_vm0, %v5605_v39 }
 0xb07   :  { %4012 = vmatprep.mubr.msk.bf16.mxu1 %vm167_vm0, %v5610_v45 }
 0xb0e   :  { %4013 = vmatmul.mubr.msk.bf16.gmra.mxu1 %vm167_vm0, %v5619_v38 }
 0xb0f   :  { %4032 = vmatprep.mubr.msk.bf16.mxu1 %vm4302_vm1, %v5847_v29 }
 0xb8c   :  { %v5625_v55 = vpop.f32.mrf.mxu0 }
 0xb8e   :  { %v3976_v2 = vpop.f32.mrf.mxu0 }
 0xb90   :  { %v5627_v25 = vpop.f32.mrf.mxu0 }
 0xb92   :  { %v3977_v20 = vpop.f32.mrf.mxu0 }
 0xbae   :  { %v2208_v16 = vpop.f32.mrf.mxu1 }
 0xbaf   :  { %v2215_v26 = vmul.f32 %v2208_v16, %v5382_v57 }
 0xbb0   :  { %v3970_v44 = vpop.f32.mrf.mxu1 }
 0xbb1   :  { %v2217_v36 = vadd.f32 %v5633_v48, %v2215_v26 }
 0xbb2   :  { %v2211_v46 = vpop.f32.mrf.mxu1 }
 0xbb3   :  { %v2216_v3 = vmul.f32 %v2211_v46, %v5385_v22  ;;  %v2219_v51 = vmax.f32 %v2217_v36, 0.0 }
 0xbb4   :  { %v3971_v15 = vpop.f32.mrf.mxu1 }
 0xbb5   :  { %v2218_v27 = vadd.f32 %v5633_v48, %v2216_v3 }
 0xbb6   :  { %v5638_v62 = vpop.f32.mrf.mxu1 }
 0xbb7   :  { %v2220_v60 = vmax.f32 %v2218_v27, 0.0 }
 0xbb8   :  { %v5640_v53 = vpop.f32.mrf.mxu1 }
 0xbb9   :  { %v2221_v57 = vpack.c.bf16 %v2220_v60, %v2219_v51 }
 0xbba   :  { %v4003_v13 = vpop.f32.mrf.mxu1 }
 0xbbb   :  { %3995 = vmatmul.mubr.bf16.vlgmr.msra.gmra.mxu0 %v2221_v57 }
 0xbbc   :  { %v2502_v42 = vpop.f32.mrf.mxu1  ;;  %4037 = vmatpush3.bf16.msra.mxu0 %v5195_v12  ;;  %4052 = vmatprep.mubr.msk.bf16.mxu0 %vm4302_vm1, %v5847_v29 }
 0xbbd   :  { %4038 = vmatprep.subr.bf16.mxu0 %v5847_v29 }
 0xbbe   :  { %v4006_v22 = vpop.f32.mrf.mxu1 }
 0xbc0   :  { %v2515_v23 = vpop.f32.mrf.mxu1  ;;  %4039 = vmatpush3.bf16.msra.mxu0 %v5208_v43 }
 0xbc1   :  { %4040 = vmatprep.subr.bf16.mxu0 %v5847_v29 }
 0xbc2   :  { %v4007_v31 = vpop.f32.mrf.mxu1 }
 0xbc3   :  { %v2649_v51 = vmul.f32 %v4007_v31, %v5424_v19 }
 0xbc4   :  { %v2518_v9 = vpop.f32.mrf.mxu1  ;;  %4041 = vmatpush3.bf16.msra.mxu0 %v5219_v5 }
 0xbc5   :  { %4042 = vmatprep.subr.bf16.mxu0 %v5847_v29 }
 0xbc6   :  { %v4010_v54 = vpop.f32.mrf.mxu1 }
 0xbc7   :  { %v2652_v3 = vmul.f32 %v4010_v54, %v5414_v17  ;;  %v2647_v54 = vmul.f32 %v5428_v28, %v2518_v9 }
 0xbc8   :  { %v2531_v37 = vpop.f32.mrf.mxu1  ;;  %4043 = vmatpush3.bf16.msra.mxu0 %v5228_v18 }
 0xbc9   :  { %4044 = vmatprep.subr.bf16.mxu0 %v5847_v29  ;;  %v2650_v27 = vmul.f32 %v5418_v34, %v2531_v37  ;;  %v2645_v37 = vmul.f32 %v4003_v13, %v5432_v41  ;;  %v5687_v13 = vld [vmem:[%s5816_s0 + $0x18] sm:$0xff]  }
 0xbca   :  { %v4011_v12 = vpop.f32.mrf.mxu1 }
 0xbcc   :  { %v2534_v2 = vpop.f32.mrf.mxu1  ;;  %4045 = vmatpush3.bf16.msra.mxu0 %v5239_v58 }
 0xbcd   :  { %4046 = vmatprep.subr.bf16.mxu0 %v5847_v29  ;;  %v2651_v15 = vmul.f32 %v5420_v11, %v2534_v2 }
 0xbce   :  { %v4014_v43 = vpop.f32.mrf.mxu1 }
 0xbcf   :  { %v2656_v16 = vmul.f32 %v4014_v43, %v5406_v24  ;;  %v2662_v60 = vpack.c.bf16 %v2651_v15, %v2650_v27  ;;  %v5848_v43 = vld [vmem:[#allocation7_spill] sm:$0xff] }
 0xbd0   :  { %v2547_v20 = vpop.f32.mrf.mxu1  ;;  %4047 = vmatpush3.bf16.msra.mxu0 %v5248_v0  ;;  %v2653_v0 = vmul.f32 %v4011_v12, %v5416_v4  ;;  %v2646_v12 = vmul.f32 %v5426_v32, %v2515_v23  ;;  %v2644_v31 = vmul.f32 %v5638_v62, %v5848_v43  ;;  %v5851_v62 = vld [vmem:[#allocation6_spill] sm:$0xff] }
 0xbd1   :  { %4048 = vmatprep.subr.bf16.mxu0 %v5847_v29  ;;  %v2654_v58 = vmul.f32 %v5410_v59, %v2547_v20  ;;  %v5849_v20 = vld [vmem:[#allocation9_spill] sm:$0xff] }
 0xbd2   :  { %v4015_v5 = vpop.f32.mrf.mxu1  ;;  %v2660_v2 = vpack.c.bf16 %v2647_v54, %v2646_v12 }
 0xbd3   :  { %v2657_v26 = vmul.f32 %v4015_v5, %v5408_v8  ;;  %v2643_v5 = vmul.f32 %v5849_v20, %v2502_v42 }
 0xbd4   :  { %v2550_v18 = vpop.f32.mrf.mxu1  ;;  %4049 = vmatpush3.bf16.msra.mxu0 %v5257_v49  ;;  %v2663_v49 = vpack.c.bf16 %v2653_v0, %v2652_v3 }
 0xbd5   :  { %v2665_v44 = vpack.c.bf16 %v2657_v26, %v2656_v16  ;;  %v2655_v46 = vmul.f32 %v5412_v21, %v2550_v18  ;;  %4050 = vmatprep.subr.bf16.mxu0 %v5847_v29  ;;  %v5850_v16 = vld [vmem:[#allocation8_spill] sm:$0xff]  ;;  %v5699_v18 = vld [vmem:[%s5826_s10] ss:$0 sm:$0xff] }
 0xbd6   :  { %v2642_v9 = vmul.f32 %v5850_v16, %v5640_v53 }
 0xbd7   :  { %4017 = vmatpush3.bf16.msra.mxu1 %v2665_v44  ;;  %v2664_v36 = vpack.c.bf16 %v2655_v46, %v2654_v58 }
 0xbd8   :  { %4018 = vmatprep.subr.bf16.mxu1 %v5847_v29  ;;  %4051 = vmatpush3.bf16.msra.mxu0 %v5268_v63  ;;  %v2648_v63 = vmul.f32 %v4006_v22, %v5422_v33  ;;  %v2659_v22 = vpack.c.bf16 %v2645_v37, %v2644_v31  ;;  %v2658_v23 = vpack.c.bf16 %v2643_v5, %v2642_v9 }
 0xbda   :  { %v2661_v57 = vpack.c.bf16 %v2649_v51, %v2648_v63 }
 0xbdb   :  { %4019 = vmatpush3.bf16.msra.mxu1 %v2664_v36 }
 0xbdc   :  { %4020 = vmatprep.subr.bf16.mxu1 %v5847_v29 }
 0xbdf   :  { %4021 = vmatpush3.bf16.msra.mxu1 %v2663_v49  ;;  %v5706_v49 = vpop.permute.xlu0 %2715 }
 0xbe0   :  { %4022 = vmatprep.subr.bf16.mxu1 %v5847_v29 }
 0xbe3   :  { %4023 = vmatpush3.bf16.msra.mxu1 %v2662_v60  ;;  %v5709_v60 = vpop.permute.xlu1 %2720 }
 0xbe4   :  { %4024 = vmatprep.subr.bf16.mxu1 %v5847_v29 }
 0xbe7   :  { %4025 = vmatpush3.bf16.msra.mxu1 %v2661_v57 }
 0xbe8   :  { %4026 = vmatprep.subr.bf16.mxu1 %v5847_v29 }
 0xbeb   :  { %4027 = vmatpush3.bf16.msra.mxu1 %v2660_v2 }
 0xbec   :  { %4028 = vmatprep.subr.bf16.mxu1 %v5847_v29 }
 0xbef   :  { %4029 = vmatpush3.bf16.msra.mxu1 %v2659_v22 }
 0xbf0   :  { %4030 = vmatprep.subr.bf16.mxu1 %v5847_v29 }
 0xbf3   :  { %4031 = vmatpush3.bf16.msra.mxu1 %v2658_v23 }
 0xbf4   :  { %4094 = vmatprep.subr.bf16.mxu1 %v5847_v29 }
 0xbf6   :  { %4033 = vmatmul.mubr.bf16.vlgmr.msra.gmra.mxu1 %v5687_v13 }
 0xbf7   :  { %4095 = vmatpush3.bf16.msra.mxu1 %v5851_v62  ;;  %4096 = vmatprep.mubr.msk.bf16.mxu1 %vm4302_vm1, %v5847_v29 }
 0xbf8   :  { %4120 = vmatprep.subr.bf16.mxu1 %v5847_v29 }
 0xc7b   :  { %v2304_v53 = vpop.f32.mrf.mxu0 }
 0xc7c   :  { %v2305_v42 = vadd.f32 %v2304_v53, %v5625_v55 }
 0xc7d   :  { %v3996_v26 = vpop.f32.mrf.mxu0 }
 0xc7e   :  { %v2311_v44 = vadd.f32 %v5699_v18, %v2305_v42 }
 0xc7f   :  { %v2307_v46 = vpop.f32.mrf.mxu0 }
 0xc80   :  { %4225 = vtanh.f32 %v2311_v44  ;;  %v2308_v58 = vadd.f32 %v2307_v46, %v5627_v25  ;;  %v5852_v25 = vld [vmem:[#allocation5_spill] sm:$0xff]  ;;  %v3337_v5 = vmul.f32 -1.442695, %v2311_v44 }
 0xc81   :  { %v3997_v0 = vpop.f32.mrf.mxu0 }
 0xc82   :  { %v2312_v36 = vadd.f32 %v5699_v18, %v2308_v58 }
 0xc84   :  { %4227 = vtanh.f32 %v2312_v36  ;;  %v3338_v9 = vmul.f32 -1.442695, %v2312_v36 }
 0xc85   :  { %4229 = vpow2.f32 %v3337_v5 }
 0xc86   :  { %4231 = vpow2.f32 %v3338_v9 }
 0xc8d   :  { %v4226_v3 = vpop.eup %4225 }
 0xc8e   :  { %2331 = vrot.lane.b32.xlu0 %v4226_v3, %s4303_s22 }
 0xc91   :  { %v4228_v55 = vpop.eup %4227 }
 0xc92   :  { %2333 = vrot.lane.b32.xlu1 %v4228_v55, %s4303_s22  ;;  %v4230_v23 = vpop.eup %4229 }
 0xc93   :  { %v2319_v62 = vadd.f32 1.0, %v4230_v23  ;;  %v4232_v53 = vpop.eup %4231 }
 0xc94   :  { %v2320_v42 = vadd.f32 1.0, %v4232_v53 }
 0xc95   :  { %4233 = vrcp.f32 %v2319_v62 }
 0xc96   :  { %4235 = vrcp.f32 %v2320_v42 }
 0xca2   :  { %v4234_v26 = vpop.eup %4233 }
 0xca3   :  { %v4236_v0 = vpop.eup %4235 }
 0xcb6   :  { %v2706_v15 = vpop.f32.mrf.mxu1 }
 0xcb7   :  { %v2723_v27 = vmul.f32 %v5706_v49, %v2706_v15 }
 0xcb8   :  { %v4034_v51 = vpop.f32.mrf.mxu1 }
 0xcb9   :  { %v2725_v57 = vadd.f32 %v5852_v25, %v2723_v27  ;;  %v5854_v27 = vld [vmem:[#allocation11_spill] sm:$0xff] }
 0xcba   :  { %v2709_v63 = vpop.f32.mrf.mxu1  ;;  %v2328_v51 = vmul.f32 %v4236_v0, %v5854_v27 }
 0xcbb   :  { %v2724_v54 = vmul.f32 %v5709_v60, %v2709_v63  ;;  %v2727_v2 = vmax.f32 %v2725_v57, 0.0 }
 0xcbc   :  { %v4035_v12 = vpop.f32.mrf.mxu1 }
 0xcbd   :  { %v2726_v37 = vadd.f32 %v5852_v25, %v2724_v54 }
 0xcbf   :  { %v2728_v31 = vmax.f32 %v2726_v37, 0.0 }
 0xcc1   :  { %v2729_v22 = vpack.c.bf16 %v2728_v31, %v2727_v2 }
 0xcc3   :  { %4053 = vmatmul.mubr.bf16.vlgmr.msra.gmra.mxu0 %v2729_v22 }
 0xcc4   :  { %4058 = vmatprep.mubr.msk.bf16.mxu0 %vm167_vm0, %v5566_v47  ;;  %v5853_v47 = vld [vmem:[#allocation10_spill] sm:$0xff] }
 0xcc5   :  { %v2327_v44 = vmul.f32 %v4234_v26, %v5853_v47 }
 0xd00   :  { %v2332_v46 = vpop.permute.xlu0 %2331 }
 0xd01   :  { %v2337_v58 = vmul.f32 %v4234_v26, %v2332_v46 }
 0xd03   :  { %2341 = vrot.lane.b32.xlu0 %v2337_v58, %s4304_s23 }
 0xd04   :  { %v2334_v3 = vpop.permute.xlu1 %2333 }
 0xd05   :  { %v2338_v55 = vmul.f32 %v4236_v0, %v2334_v3 }
 0xd07   :  { %2343 = vrot.lane.b32.xlu1 %v2338_v55, %s4304_s23 }
 0xd75   :  { %v2342_v36 = vpop.permute.xlu0 %2341 }
 0xd76   :  { %v5719_v15 = vadd.f32 %v2342_v36, %v2327_v44 }
 0xd78   :  { %4237 = vtanh.f32 %v5719_v15 }
 0xd79   :  { %v2344_v63 = vpop.permute.xlu1 %2343 }
 0xd7a   :  { %v5723_v25 = vadd.f32 %v2344_v63, %v2328_v51 }
 0xd7c   :  { %4239 = vtanh.f32 %v5723_v25 }
 0xd83   :  { %v2764_v57 = vpop.f32.mrf.mxu0 }
 0xd85   :  { %v4238_v54 = vpop.eup %4237  ;;  %v4054_v12 = vpop.f32.mrf.mxu0 }
 0xd86   :  { %2353 = vrot.lane.b32.xlu0 %v4238_v54, %s4305_s24 }
 0xd87   :  { %v2767_v37 = vpop.f32.mrf.mxu0 }
 0xd88   :  { %v2771_v2 = vpack.c.bf16 %v2767_v37, %v2764_v57 }
 0xd89   :  { %v4240_v31 = vpop.eup %4239  ;;  %v4055_v22 = vpop.f32.mrf.mxu0 }
 0xd8a   :  { %2355 = vrot.lane.b32.xlu1 %v4240_v31, %s4305_s24  ;;  %4056 = vmatprep.subr.bf16.mxu0 %v2771_v2 }
 0xd8b   :  { %4057 = vmatpush3.bf16.msra.mxu0 %v2771_v2 }
 0xd8c   :  { %4074 = vmatprep.subr.bf16.mxu0 %v5847_v29 }
 0xd8e   :  { %4059 = vmatmul.mubr.msk.bf16.vlgmr.msra.gmra.mxu0 %vm167_vm0, %v5577_v6 }
 0xd8f   :  { %4062 = vmatprep.mubr.msk.bf16.mxu0 %vm167_vm0, %v5582_v52 }
 0xd96   :  { %4063 = vmatmul.mubr.msk.bf16.gmra.mxu0 %vm167_vm0, %v5591_v10 }
 0xd97   :  { %4066 = vmatprep.mubr.msk.bf16.mxu0 %vm167_vm0, %v5596_v56 }
 0xd9e   :  { %4067 = vmatmul.mubr.msk.bf16.gmra.mxu0 %vm167_vm0, %v5605_v39 }
 0xd9f   :  { %4070 = vmatprep.mubr.msk.bf16.mxu0 %vm167_vm0, %v5610_v45 }
 0xda6   :  { %4071 = vmatmul.mubr.msk.bf16.gmra.mxu0 %vm167_vm0, %v5619_v38 }
 0xda7   :  { %4090 = vmatprep.mubr.msk.bf16.mxu0 %vm4302_vm1, %v5847_v29 }
 0xdf8   :  { %v2354_v6 = vpop.permute.xlu0 %2353 }
 0xdf9   :  { %v2359_v5 = vmul.f32 %v4234_v26, %v2354_v6 }
 0xdfc   :  { %v2356_v52 = vpop.permute.xlu1 %2355 }
 0xdfd   :  { %v2360_v9 = vmul.f32 %v4236_v0, %v2356_v52 }
 0xdff   :  { %v2941_v10 = vpack.c.bf16 %v2360_v9, %v2359_v5 }
 0xe01   :  { %2943 = vrot.lane.b32.xlu0 %v2941_v10, %s4306_s29 }
 0xe4e   :  { %v4060_v56 = vpop.f32.mrf.mxu0 }
 0xe4f   :  { %v2871_v52 = vmul.f32 %v4060_v56, %v5848_v43 }
 0xe50   :  { %v2806_v23 = vpop.f32.mrf.mxu0 }
 0xe51   :  { %v2869_v5 = vmul.f32 %v2806_v23, %v5850_v16 }
 0xe52   :  { %v4061_v62 = vpop.f32.mrf.mxu0 }
 0xe54   :  { %v2809_v39 = vpop.f32.mrf.mxu0 }
 0xe56   :  { %v4064_v53 = vpop.f32.mrf.mxu0 }
 0xe58   :  { %v2822_v42 = vpop.f32.mrf.mxu0 }
 0xe5a   :  { %v4065_v45 = vpop.f32.mrf.mxu0 }
 0xe5c   :  { %v2825_v46 = vpop.f32.mrf.mxu0 }
 0xe5d   :  { %v2874_v22 = vmul.f32 %v2825_v46, %v5428_v28 }
 0xe5e   :  { %v4068_v58 = vpop.f32.mrf.mxu0 }
 0xe5f   :  { %v2879_v37 = vmul.f32 %v4068_v58, %v5414_v17 }
 0xe60   :  { %v2838_v38 = vpop.f32.mrf.mxu0 }
 0xe62   :  { %v4069_v3 = vpop.f32.mrf.mxu0 }
 0xe63   :  { %v2880_v54 = vmul.f32 %v4069_v3, %v5416_v4  ;;  %v2875_v4 = vmul.f32 %v4064_v53, %v5422_v33 }
 0xe64   :  { %v2841_v55 = vpop.f32.mrf.mxu0 }
 0xe66   :  { %v4072_v47 = vpop.f32.mrf.mxu0 }
 0xe67   :  { %v2883_v26 = vmul.f32 %v4072_v47, %v5406_v24  ;;  %v2890_v24 = vpack.c.bf16 %v2880_v54, %v2879_v37 }
 0xe68   :  { %v2854_v44 = vpop.f32.mrf.mxu0 }
 0xe69   :  { %v2881_v57 = vmul.f32 %v2854_v44, %v5410_v59  ;;  %v2877_v59 = vmul.f32 %v2838_v38, %v5418_v34  ;;  %v2872_v34 = vmul.f32 %v4061_v62, %v5432_v41 }
 0xe6a   :  { %v4073_v36 = vpop.f32.mrf.mxu0 }
 0xe6b   :  { %v2884_v0 = vmul.f32 %v4073_v36, %v5408_v8  ;;  %v2878_v8 = vmul.f32 %v2841_v55, %v5420_v11  ;;  %v2873_v11 = vmul.f32 %v2822_v42, %v5426_v32  ;;  %v2886_v33 = vpack.c.bf16 %v2872_v34, %v2871_v52 }
 0xe6c   :  { %v2857_v27 = vpop.f32.mrf.mxu0 }
 0xe6d   :  { %v2892_v51 = vpack.c.bf16 %v2884_v0, %v2883_v26  ;;  %v2882_v63 = vmul.f32 %v2857_v27, %v5412_v21  ;;  %v2876_v21 = vmul.f32 %v4065_v45, %v5424_v19  ;;  %v2889_v17 = vpack.c.bf16 %v2878_v8, %v2877_v59 }
 0xe6e   :  { %v2887_v6 = vpack.c.bf16 %v2874_v22, %v2873_v11  ;;  %v2870_v19 = vmul.f32 %v2809_v39, %v5849_v20 }
 0xe6f   :  { %4075 = vmatpush3.bf16.msra.mxu0 %v2892_v51  ;;  %v2891_v12 = vpack.c.bf16 %v2882_v63, %v2881_v57  ;;  %v2888_v31 = vpack.c.bf16 %v2876_v21, %v2875_v4 }
 0xe70   :  { %4076 = vmatprep.subr.bf16.mxu0 %v5847_v29  ;;  %v2885_v32 = vpack.c.bf16 %v2870_v19, %v2869_v5 }
 0xe73   :  { %v2944_v2 = vpop.permute.xlu0 %2943  ;;  %4077 = vmatpush3.bf16.msra.mxu0 %v2891_v12  ;;  %v4192_v12 = vld [vmem:[%s5827_s11] sm:$0xff]  }
 0xe74   :  { %4097 = vmatmul.mubr.msk.bf16.vlgmr.msra.gmra.mxu1 %vm167_vm0, %v2944_v2  ;;  %4078 = vmatprep.subr.bf16.mxu0 %v5847_v29 }
 0xe75   :  { %4122 = vmatprep.mubr.msk.bf16.mxu1 %vm4302_vm1, %v5847_v29  ;;  %4121 = vmatpush3.bf16.msra.mxu1 %v4192_v12 }
 0xe77   :  { %4079 = vmatpush3.bf16.msra.mxu0 %v2890_v24 }
 0xe78   :  { %4080 = vmatprep.subr.bf16.mxu0 %v5847_v29 }
 0xe7b   :  { %4081 = vmatpush3.bf16.msra.mxu0 %v2889_v17 }
 0xe7c   :  { %4082 = vmatprep.subr.bf16.mxu0 %v5847_v29 }
 0xe7f   :  { %4083 = vmatpush3.bf16.msra.mxu0 %v2888_v31  ;;  %v3403_v31 = vld [vmem:[%s5828_s12] ss:$0 sm:$0xff] }
 0xe80   :  { %4084 = vmatprep.subr.bf16.mxu0 %v5847_v29 }
 0xe83   :  { %4085 = vmatpush3.bf16.msra.mxu0 %v2887_v6 }
 0xe84   :  { %4086 = vmatprep.subr.bf16.mxu0 %v5847_v29 }
 0xe87   :  { %4087 = vmatpush3.bf16.msra.mxu0 %v2886_v33 }
 0xe88   :  { %4088 = vmatprep.subr.bf16.mxu0 %v5847_v29 }
 0xe8b   :  { %4089 = vmatpush3.bf16.msra.mxu0 %v2885_v32 }
 0xe8c   :  { %4100 = vmatprep.subr.bf16.mxu0 %v5847_v29 }
 0xe8e   :  { %4091 = vmatmul.mubr.bf16.vlgmr.msra.gmra.mxu0 %v5687_v13 }
 0xe8f   :  { %4101 = vmatpush3.bf16.msra.mxu0 %v5485_v30  ;;  %4116 = vmatprep.mubr.msk.bf16.mxu0 %vm4302_vm1, %v5847_v29 }
 0xe90   :  { %4102 = vmatprep.subr.bf16.mxu0 %v5847_v29 }
 0xe93   :  { %4103 = vmatpush3.bf16.msra.mxu0 %v5497_v1 }
 0xe94   :  { %4104 = vmatprep.subr.bf16.mxu0 %v5847_v29 }
 0xe97   :  { %4105 = vmatpush3.bf16.msra.mxu0 %v5507_v50 }
 0xe98   :  { %4106 = vmatprep.subr.bf16.mxu0 %v5847_v29 }
 0xe9b   :  { %4107 = vmatpush3.bf16.msra.mxu0 %v5517_v61 }
 0xe9c   :  { %4108 = vmatprep.subr.bf16.mxu0 %v5847_v29 }
 0xe9f   :  { %4109 = vmatpush3.bf16.msra.mxu0 %v5527_v7 }
 0xea0   :  { %4110 = vmatprep.subr.bf16.mxu0 %v5847_v29 }
 0xea3   :  { %4111 = vmatpush3.bf16.msra.mxu0 %v5537_v40 }
 0xea4   :  { %4112 = vmatprep.subr.bf16.mxu0 %v5847_v29 }
 0xea7   :  { %4113 = vmatpush3.bf16.msra.mxu0 %v5549_v14 }
 0xea8   :  { %4114 = vmatprep.subr.bf16.mxu0 %v5847_v29 }
 0xeab   :  { %4115 = vmatpush3.bf16.msra.mxu0 %v5559_v35 }
 0xf34   :  { %v2982_v28 = vpop.f32.mrf.mxu1 }
 0xf36   :  { %v4098_v30 = vpop.f32.mrf.mxu1 }
 0xf38   :  { %v2985_v41 = vpop.f32.mrf.mxu1 }
 0xf3a   :  { %v4099_v1 = vpop.f32.mrf.mxu1 }
 0xf4e   :  { %v2927_v50 = vpop.f32.mrf.mxu0 }
 0xf4f   :  { %v2934_v61 = vmul.f32 %v2927_v50, %v5706_v49 }
 0xf50   :  { %v4092_v7 = vpop.f32.mrf.mxu0 }
 0xf51   :  { %v2936_v20 = vadd.f32 %v5633_v48, %v2934_v61 }
 0xf52   :  { %v2930_v43 = vpop.f32.mrf.mxu0 }
 0xf53   :  { %v2935_v40 = vmul.f32 %v2930_v43, %v5709_v60  ;;  %v2938_v13 = vmax.f32 %v2936_v20, 0.0 }
 0xf54   :  { %v4093_v16 = vpop.f32.mrf.mxu0 }
 0xf55   :  { %v2937_v14 = vadd.f32 %v5633_v48, %v2935_v40 }
 0xf57   :  { %v2939_v29 = vmax.f32 %v2937_v14, 0.0 }
 0xf59   :  { %v2940_v9 = vpack.c.bf16 %v2939_v29, %v2938_v13 }
 0xf5b   :  { %4117 = vmatmul.mubr.bf16.vlgmr.msra.gmra.mxu0 %v2940_v9 }
0x101b   :  { %v3023_v35 = vpop.f32.mrf.mxu0 }
0x101c   :  { %v3024_v10 = vadd.f32 %v3023_v35, %v2982_v28 }
0x101d   :  { %v4118_v56 = vpop.f32.mrf.mxu0 }
0x101e   :  { %v3030_v23 = vadd.f32 %v5699_v18, %v3024_v10 }
0x101f   :  { %v3026_v62 = vpop.f32.mrf.mxu0 }
0x1020   :  { %4241 = vtanh.f32 %v3030_v23  ;;  %v3027_v49 = vadd.f32 %v3026_v62, %v2985_v41  ;;  %v3401_v42 = vmul.f32 -1.442695, %v3030_v23 }
0x1021   :  { %v4119_v39 = vpop.f32.mrf.mxu0 }
0x1022   :  { %v3031_v53 = vadd.f32 %v5699_v18, %v3027_v49 }
0x1024   :  { %4243 = vtanh.f32 %v3031_v53  ;;  %v3402_v45 = vmul.f32 -1.442695, %v3031_v53 }
0x1025   :  { %4245 = vpow2.f32 %v3401_v42 }
0x1026   :  { %4247 = vpow2.f32 %v3402_v45 }
0x102d   :  { %v4242_v60 = vpop.eup %4241 }
0x102e   :  { %3050 = vrot.lane.b32.xlu1 %v4242_v60, %s4303_s22 }
0x1031   :  { %v4244_v48 = vpop.eup %4243 }
0x1032   :  { %3052 = vrot.lane.b32.xlu0 %v4244_v48, %s4303_s22  ;;  %v4246_v46 = vpop.eup %4245 }
0x1033   :  { %v3038_v58 = vadd.f32 1.0, %v4246_v46  ;;  %v4248_v38 = vpop.eup %4247 }
0x1034   :  { %v3039_v3 = vadd.f32 1.0, %v4248_v38 }
0x1035   :  { %4249 = vrcp.f32 %v3038_v58 }
0x1036   :  { %4251 = vrcp.f32 %v3039_v3 }
0x1042   :  { %v4250_v55 = vpop.eup %4249 }
0x1043   :  { %v4252_v44 = vpop.eup %4251  ;;  %v3046_v0 = vmul.f32 %v4250_v55, %v5719_v15 }
0x1044   :  { %v3047_v63 = vmul.f32 %v4252_v44, %v5723_v25 }
0x10a0   :  { %v3051_v47 = vpop.permute.xlu1 %3050 }
0x10a1   :  { %v3056_v18 = vmul.f32 %v4250_v55, %v3051_v47 }
0x10a3   :  { %3060 = vrot.lane.b32.xlu1 %v3056_v18, %s4304_s23 }
0x10a4   :  { %v3053_v36 = vpop.permute.xlu0 %3052 }
0x10a5   :  { %v3057_v26 = vmul.f32 %v4252_v44, %v3053_v36 }
0x10a7   :  { %3062 = vrot.lane.b32.xlu0 %v3057_v26, %s4304_s23  ;;  %s4307_s23 = smov [#allocation2]  }
0x1115   :  { %v3061_v27 = vpop.permute.xlu1 %3060 }
0x1116   :  { %v3066_v51 = vadd.f32 %v3061_v27, %v3046_v0 }
0x1118   :  { %4253 = vtanh.f32 %v3066_v51 }
0x1119   :  { %v3063_v57 = vpop.permute.xlu0 %3062 }
0x111a   :  { %v3067_v54 = vadd.f32 %v3063_v57, %v3047_v63 }
0x111c   :  { %4255 = vtanh.f32 %v3067_v54 }
0x1125   :  { %v4254_v37 = vpop.eup %4253 }
0x1126   :  { %3072 = vrot.lane.b32.xlu1 %v4254_v37, %s4305_s24 }
0x1129   :  { %v4256_v2 = vpop.eup %4255 }
0x112a   :  { %3074 = vrot.lane.b32.xlu0 %v4256_v2, %s4305_s24  ;;  %s3152_s24 = sshll.u32 %s4307_s23, 4  ;;  %s3153_s24 = int_to_ptr.vmem [resolvable:$true] %s3152_s24 }
0x112b   :  { %s4278_s9 = scalar_lea.vmem %s3153_s24, 256  ;;  %p4283_p1 = scmp.lt.s32.totalorder %s3153_s24, %s3153_s24 }
0x112c   :  { %p4279_p0 = scmp.ne.s32.totalorder %s3153_s24, %s4278_s9  ;;  %p4284_p2 = scmp.lt.s32.totalorder %s4278_s9, %s4278_s9 }
0x112e   :  { %p4285_p3 = por %p4284_p2, %p4283_p1 }
0x1130   :  { %p4286_p4 = pnand %p4285_p3, %p4279_p0 }
0x1198   :  { %v3073_v15 = vpop.permute.xlu1 %3072 }
0x1199   :  { %v3078_v24 = vmul.f32 %v4250_v55, %v3073_v15 }
0x119b   :  { %v3080_v21 = vmax.f32 %v3078_v24, 0.0 }
0x119c   :  { %v3075_v8 = vpop.permute.xlu0 %3074 }
0x119d   :  { %v3079_v59 = vmul.f32 %v4252_v44, %v3075_v8 }
0x119f   :  { %v3081_v25 = vmax.f32 %v3079_v59, 0.0 }
0x11a1   :  { %v3082_v17 = vpack.c.bf16 %v3081_v25, %v3080_v21 }
0x11a3   :  { %3093 = vrot.lane.b32.xlu1 %v3082_v17, %s4306_s29 }
0x1215   :  { %v3094_v4 = vpop.permute.xlu1 %3093 }
0x1216   :  { %4123 = vmatmul.mubr.msk.bf16.vlgmr.msra.gmra.mxu1 %vm167_vm0, %v3094_v4 }
0x12d6   :  { %v3138_v22 = vpop.f32.mrf.mxu1 }
0x12d7   :  { %v3139_v11 = vadd.f32 %v3403_v31, %v3138_v22 }
0x12d8   :  { %v4124_v34 = vpop.f32.mrf.mxu1 }
0x12d9   :  { %3145 = vst [vmem:[#allocation2] sm:$0xff] %v3139_v11 }
0x12da   :  { %v3141_v6 = vpop.f32.mrf.mxu1 }
0x12db   :  { %v3142_v52 = vadd.f32 %v3403_v31, %v3141_v6 }
0x12dc   :  { %v4125_v33 = vpop.f32.mrf.mxu1 }
0x12dd   :  { %3146 = vst [vmem:[#allocation2 + $0x8] sm:$0xff] %v3142_v52 }
0x12de   :  { %4289 = shalt.err (!%p4286_p4)
}
0x12df   :  { %s4308_s29 = smov 128   ;;  %s4309_s12 = smov 8  }
0x12e0   :  { %3158 = dma.vmem_to_hbm [thread:$0]  %s3153_s24, 256, %s5829_s13, [#allocation3], %s4308_s29, %s4308_s29, %s4309_s12  }
0x12e1   :  { %4298 = dma.done.wait [#allocation3], 256  }
0x12e2   :  { %4299 = vsyncadd [#allocation3], 4294967040 }
0x12e3   :  { %3162 = vsyncpa [#allocation3], 1 }

</bundles_post_ra>
